<compile_context>
chip_gen: v5e
topology: v5e:2x2
jax: 0.10.0
libtpu: 0.0.40
codegen_flags: <defaults>
</compile_context>

<pallas_src>
import functools

import jax
import jax.numpy as jnp
from jax.experimental import pallas as pl
from jax.experimental.pallas import tpu as pltpu

POOL_W = 20   # AdaptiveMaxPool2d target width (fixed by the module)
BN_EPS = 1e-5


def _local_kernel(x_ref, prm_ref, o_ref, *, B, C, C2, W, k, BI):
    """Processes one group of B samples.

    x_ref  : (B, C, H, W)                input tile (VMEM)
    prm_ref: (C*C*3 + C + C2*C + C2,)    folded conv/BN params (SMEM, f32)
    o_ref  : (1, C2, B, W)               output tile; valid data at lanes w = bin*k
    """
    f32 = jnp.float32
    # packed-parameter offsets (conv weights already carry the BN scale)
    OW1 = 0                   # w1' = bn1_scale[o] * conv1.weight[o, i, t]
    OSH1 = OW1 + C * C * 3    # sh1 = bn1 shift, per conv1 output channel
    OW2 = OSH1 + C            # w2' = bn2_scale[o2] * conv2.weight[o2, i]
    OSH2 = OW2 + C2 * C       # sh2 = bn2 shift

    # ---- AdaptiveMaxPool2d((1, 20)) ---------------------------------------
    # Stage 1: reduce H on the natural (H, W)-tiled layout, a few samples at a
    #          time so live values stay small.
    # Stage 2: reduce each k-wide width bin with lane shifts.  Afterwards lane
    #          p = bin*k of pooled[c] holds that bin's pooled value; the other
    #          lanes carry ignored values that the wrapper strips.
    pooled = []                                          # per in-channel (B, W)
    for c in range(C):
        rows = []
        for b0 in range(0, B, BI):
            bi = min(BI, B - b0)
            chunk = x_ref[b0:b0 + bi, c].astype(f32)     # (bi, H, W)
            rows.append(jnp.max(chunk, axis=1))          # (bi, W)
        hmax = jnp.concatenate(rows, axis=0) if len(rows) > 1 else rows[0]
        binmax = hmax
        for j in range(1, k):
            shifted = jnp.concatenate(
                [hmax[:, j:], jnp.full((B, j), -jnp.inf, f32)], axis=1)
            binmax = jnp.maximum(binmax, shifted)
        pooled.append(binmax)                            # (B, W)

    # ---- cnn1 (1x3, pad (0,1)) + bn1 + ReLU -------------------------------
    # Conv taps at w-1 / w / w+1 become shifts by k lanes; the zero columns
    # provide the conv zero padding (samples are rows, so no cross-sample
    # bleed is possible).
    zpad = jnp.zeros((B, k), f32)
    p_prev = [jnp.concatenate([zpad, p[:, :W - k]], axis=1) for p in pooled]
    p_next = [jnp.concatenate([p[:, k:], zpad], axis=1) for p in pooled]

    # C = 3 by default, so the contraction is done as scalar*vector FMAs on
    # the VPU; the MXU would be >97% padding for a 3-deep contraction.
    # TODO(synk): for large channel counts (C >= 128) switch these loops to a
    # fused (C, 3C) @ (3C, lanes) MXU contraction.
    y = []
    for o in range(C):
        acc = jnp.zeros((B, W), f32)
        for i in range(C):
            widx = OW1 + (o * C + i) * 3
            acc = acc + prm_ref[widx + 0] * p_prev[i]
            acc = acc + prm_ref[widx + 1] * pooled[i]
            acc = acc + prm_ref[widx + 2] * p_next[i]
        y.append(jnp.maximum(acc + prm_ref[OSH1 + o], 0.0))

    # Dropout2d(0.2): identity at inference.
    # TODO(synk): training-mode channel dropout (stateful PRNG mask) not implemented.

    # ---- cnn2 (1x1) + bn2 + ReLU ------------------------------------------
    for o2 in range(C2):
        acc = jnp.zeros((B, W), f32)
        for i in range(C):
            acc = acc + prm_ref[OW2 + o2 * C + i] * y[i]
        z = jnp.maximum(acc + prm_ref[OSH2 + o2], 0.0)
        o_ref[0, o2] = z.astype(o_ref.dtype)


def local_forward(x, params, *, block_b=32):
    """x: (N, C, H, W) float, W a multiple of 20.  Returns (N, dim2, 1, 20)."""
    N, C, H, W = x.shape
    assert W % POOL_W == 0, "adaptive max pool implemented for W % 20 == 0"
    k = W // POOL_W

    w1 = params["w1"]                                  # (C, C, 3)
    w2 = params["w2"]                                  # (C2, C)
    C2 = w2.shape[0]

    # Fold eval-mode BatchNorm scale into the conv weights; pack all params
    # into one small f32 vector that lives in SMEM (scalar path).
    inv1 = params["g1"] / jnp.sqrt(params["v1"] + BN_EPS)
    inv2 = params["g2"] / jnp.sqrt(params["v2"] + BN_EPS)
    w1f = (w1 * inv1[:, None, None]).astype(jnp.float32)
    sh1 = (params["b1"] - params["m1"] * inv1).astype(jnp.float32)
    w2f = (w2 * inv2[:, None]).astype(jnp.float32)
    sh2 = (params["b2"] - params["m2"] * inv2).astype(jnp.float32)
    prm = jnp.concatenate(
        [w1f.reshape(-1), sh1.reshape(-1), w2f.reshape(-1), sh2.reshape(-1)])

    # Samples per grid step: large enough to amortize the per-step pipeline
    # overhead with one big contiguous DMA, small enough that double-buffered
    # tiles stay well inside VMEM (v7x: 64 MiB physical), and >=2 grid steps
    # so both v7x TensorCores get work.
    itemsize = x.dtype.itemsize
    pad_h = ((H + 7) // 8) * 8
    pad_w = ((W + 127) // 128) * 128
    per_sample_vmem = C * pad_h * pad_w * itemsize
    bb = max(1, min(block_b, (N + 1) // 2,
                    (8 * 1024 * 1024) // (2 * per_sample_vmem)))
    G = pl.cdiv(N, bb)
    pad_n = G * bb - N
    if pad_n:
        x = jnp.pad(x, ((0, pad_n), (0, 0), (0, 0), (0, 0)))

    # Inner sample-chunk size for the H reduction (keeps live vregs bounded).
    tiles_per_sample = (pad_h // 8) * (pad_w // 128)
    bi = max(1, min(bb, max(1, 16 // tiles_per_sample)))

    kernel = functools.partial(_local_kernel, B=bb, C=C, C2=C2, W=W, k=k, BI=bi)

    out = pl.pallas_call(
        kernel,
        out_shape=jax.ShapeDtypeStruct((G, C2, bb, W), x.dtype),
        grid_spec=pltpu.PrefetchScalarGridSpec(
            num_scalar_prefetch=0,
            grid=(G,),
            in_specs=[
                pl.BlockSpec((bb, C, H, W), lambda g: (g, 0, 0, 0)),
                pl.BlockSpec(memory_space=pltpu.MemorySpace.SMEM),
            ],
            out_specs=pl.BlockSpec((1, C2, bb, W), lambda g: (g, 0, 0, 0)),
        ),
        compiler_params=pltpu.CompilerParams(
            dimension_semantics=("parallel",),
            vmem_limit_bytes=32 * 1024 * 1024,
        ),
    )(x, prm)

    # Strip the strided lanes (valid bins sit at w = bin*k) and restore the
    # PyTorch layout (N, C2, 1, 20) -- layout plumbing on the tiny output.
    out = out[:, :, :, ::k]                        # (G, C2, bb, 20)
    out = jnp.transpose(out, (0, 2, 1, 3))         # (G, bb, C2, 20)
    return out.reshape(G * bb, C2, 1, POOL_W)[:N]


def _local_reference(x, params):
    """Pure-JAX eval-mode reference of local.forward (for validation)."""
    N, C, H, W = x.shape
    k = W // POOL_W
    hi = jax.lax.Precision.HIGHEST
    pooled = jnp.max(x.reshape(N, C, H, POOL_W, k), axis=(2, 4))   # (N, C, 20)
    pp = jnp.pad(pooled, ((0, 0), (0, 0), (1, 1)))
    y = sum(jnp.einsum("oi,niw->now", params["w1"][:, :, t],
                       pp[:, :, t:t + POOL_W], precision=hi) for t in range(3))
    inv1 = params["g1"] / jnp.sqrt(params["v1"] + BN_EPS)
    y = jnp.maximum(y * inv1[None, :, None]
                    + (params["b1"] - params["m1"] * inv1)[None, :, None], 0.0)
    z = jnp.einsum("oi,niw->now", params["w2"], y, precision=hi)
    inv2 = params["g2"] / jnp.sqrt(params["v2"] + BN_EPS)
    z = jnp.maximum(z * inv2[None, :, None]
                    + (params["b2"] - params["m2"] * inv2)[None, :, None], 0.0)
    return z[:, :, None, :]


def init_params(key, dim1=3, dim2=3):
    ks = jax.random.split(key, 8)
    return {
        # Conv2d(dim1, dim1, (1,3)) weight: (out, in, 1, 3) -> squeeze kh
        "w1": 0.1 * jax.random.normal(ks[0], (dim1, dim1, 3), jnp.float32),
        # Conv2d(dim1, dim2, 1) weight: (out, in, 1, 1) -> (out, in)
        "w2": 0.1 * jax.random.normal(ks[1], (dim2, dim1), jnp.float32),
        # BatchNorm2d(dim1) params + running stats (eval mode)
        "g1": jax.random.uniform(ks[2], (dim1,), jnp.float32, 0.5, 1.5),
        "b1": 0.1 * jax.random.normal(ks[3], (dim1,), jnp.float32),
        "m1": 0.1 * jax.random.normal(ks[4], (dim1,), jnp.float32),
        "v1": jax.random.uniform(ks[5], (dim1,), jnp.float32, 0.5, 1.5),
        # BatchNorm2d(dim2)
        "g2": jax.random.uniform(ks[6], (dim2,), jnp.float32, 0.5, 1.5),
        "b2": 0.1 * jax.random.normal(ks[7], (dim2,), jnp.float32),
        "m2": jnp.zeros((dim2,), jnp.float32),
        "v2": jnp.ones((dim2,), jnp.float32),
    }


if __name__ == "__main__":
    key = jax.random.PRNGKey(0)
    kx, kp = jax.random.split(key)

    # module defaults dim1 = dim2 = 3; W = 40 -> two source columns per pooled bin
    N, C, H, W = 64, 3, 16, 40
    x = jax.random.normal(kx, (N, C, H, W), jnp.float32)
    params = init_params(kp, dim1=3, dim2=3)

    out = jax.block_until_ready(local_forward(x, params, block_b=32))
    assert out.shape == (N, 3, 1, POOL_W) and out.dtype == jnp.float32

    ref = jax.block_until_ready(_local_reference(x, params))
    assert bool(jnp.allclose(out, ref, atol=1e-4, rtol=1e-4)), "mismatch vs reference"
    print("KERNEL_OK")
</pallas_src>

<mosaic_0001>
module attributes {stable_mosaic.version = 11 : i64} {
  func.func @_local_kernel(%arg0: i32, %arg1: memref<32x3x16x40xf32, #tpu.memory_space<vmem>>, %arg2: memref<42xf32, #tpu.memory_space<smem>>, %arg3: memref<1x3x32x40xf32, #tpu.memory_space<vmem>>) attributes {dimension_semantics = [#tpu.dimension_semantics<parallel>], iteration_bounds = array<i64: 2>, scalar_prefetch = 0 : i64, scratch_operands = 0 : i64, tpu.core_type = #tpu.core_type<tc>, window_params = [{transform_indices = @transform_0, window_bounds = array<i64: 32, 3, 16, 40>}, {transform_indices = @transform_1, window_bounds = array<i64: 42>}, {transform_indices = @transform_2, window_bounds = array<i64: 1, 3, 32, 40>}]} {
    %c0 = arith.constant 0 : index
    %c0_0 = arith.constant 0 : index
    %c0_1 = arith.constant 0 : index
    %c0_2 = arith.constant 0 : index
    %0 = vector.load %arg1[%c0, %c0_0, %c0_1, %c0_2] : memref<32x3x16x40xf32, #tpu.memory_space<vmem>>, vector<8x1x16x40xf32>
    %1 = vector.shape_cast %0 : vector<8x1x16x40xf32> to vector<8x16x40xf32>
    %cst = arith.constant dense<0xFF800000> : vector<8x40xf32>
    %2 = vector.multi_reduction <maximumf>, %1, %cst [1] : vector<8x16x40xf32> to vector<8x40xf32>
    %c8 = arith.constant 8 : index
    %c0_3 = arith.constant 0 : index
    %c0_4 = arith.constant 0 : index
    %c0_5 = arith.constant 0 : index
    %3 = vector.load %arg1[%c8, %c0_3, %c0_4, %c0_5] : memref<32x3x16x40xf32, #tpu.memory_space<vmem>>, vector<8x1x16x40xf32>
    %4 = vector.shape_cast %3 : vector<8x1x16x40xf32> to vector<8x16x40xf32>
    %cst_6 = arith.constant dense<0xFF800000> : vector<8x40xf32>
    %5 = vector.multi_reduction <maximumf>, %4, %cst_6 [1] : vector<8x16x40xf32> to vector<8x40xf32>
    %c16 = arith.constant 16 : index
    %c0_7 = arith.constant 0 : index
    %c0_8 = arith.constant 0 : index
    %c0_9 = arith.constant 0 : index
    %6 = vector.load %arg1[%c16, %c0_7, %c0_8, %c0_9] : memref<32x3x16x40xf32, #tpu.memory_space<vmem>>, vector<8x1x16x40xf32>
    %7 = vector.shape_cast %6 : vector<8x1x16x40xf32> to vector<8x16x40xf32>
    %cst_10 = arith.constant dense<0xFF800000> : vector<8x40xf32>
    %8 = vector.multi_reduction <maximumf>, %7, %cst_10 [1] : vector<8x16x40xf32> to vector<8x40xf32>
    %c24 = arith.constant 24 : index
    %c0_11 = arith.constant 0 : index
    %c0_12 = arith.constant 0 : index
    %c0_13 = arith.constant 0 : index
    %9 = vector.load %arg1[%c24, %c0_11, %c0_12, %c0_13] : memref<32x3x16x40xf32, #tpu.memory_space<vmem>>, vector<8x1x16x40xf32>
    %10 = vector.shape_cast %9 : vector<8x1x16x40xf32> to vector<8x16x40xf32>
    %cst_14 = arith.constant dense<0xFF800000> : vector<8x40xf32>
    %11 = vector.multi_reduction <maximumf>, %10, %cst_14 [1] : vector<8x16x40xf32> to vector<8x40xf32>
    %12 = tpu.concatenate %2, %5, %8, %11 in 0 : vector<8x40xf32>, vector<8x40xf32>, vector<8x40xf32>, vector<8x40xf32> -> vector<32x40xf32>
    %13 = vector.extract_strided_slice %12 {offsets = [0, 1], sizes = [32, 39], strides = [1, 1]} : vector<32x40xf32> to vector<32x39xf32>
    %cst_15 = arith.constant 0xFF800000 : f32
    %14 = vector.broadcast %cst_15 : f32 to vector<32x1xf32>
    %15 = tpu.concatenate %13, %14 in 1 : vector<32x39xf32>, vector<32x1xf32> -> vector<32x40xf32>
    %16 = arith.maximumf %12, %15 : vector<32x40xf32>
    %c0_16 = arith.constant 0 : index
    %c1 = arith.constant 1 : index
    %c0_17 = arith.constant 0 : index
    %c0_18 = arith.constant 0 : index
    %17 = vector.load %arg1[%c0_16, %c1, %c0_17, %c0_18] : memref<32x3x16x40xf32, #tpu.memory_space<vmem>>, vector<8x1x16x40xf32>
    %18 = vector.shape_cast %17 : vector<8x1x16x40xf32> to vector<8x16x40xf32>
    %cst_19 = arith.constant dense<0xFF800000> : vector<8x40xf32>
    %19 = vector.multi_reduction <maximumf>, %18, %cst_19 [1] : vector<8x16x40xf32> to vector<8x40xf32>
    %c8_20 = arith.constant 8 : index
    %c1_21 = arith.constant 1 : index
    %c0_22 = arith.constant 0 : index
    %c0_23 = arith.constant 0 : index
    %20 = vector.load %arg1[%c8_20, %c1_21, %c0_22, %c0_23] : memref<32x3x16x40xf32, #tpu.memory_space<vmem>>, vector<8x1x16x40xf32>
    %21 = vector.shape_cast %20 : vector<8x1x16x40xf32> to vector<8x16x40xf32>
    %cst_24 = arith.constant dense<0xFF800000> : vector<8x40xf32>
    %22 = vector.multi_reduction <maximumf>, %21, %cst_24 [1] : vector<8x16x40xf32> to vector<8x40xf32>
    %c16_25 = arith.constant 16 : index
    %c1_26 = arith.constant 1 : index
    %c0_27 = arith.constant 0 : index
    %c0_28 = arith.constant 0 : index
    %23 = vector.load %arg1[%c16_25, %c1_26, %c0_27, %c0_28] : memref<32x3x16x40xf32, #tpu.memory_space<vmem>>, vector<8x1x16x40xf32>
    %24 = vector.shape_cast %23 : vector<8x1x16x40xf32> to vector<8x16x40xf32>
    %cst_29 = arith.constant dense<0xFF800000> : vector<8x40xf32>
    %25 = vector.multi_reduction <maximumf>, %24, %cst_29 [1] : vector<8x16x40xf32> to vector<8x40xf32>
    %c24_30 = arith.constant 24 : index
    %c1_31 = arith.constant 1 : index
    %c0_32 = arith.constant 0 : index
    %c0_33 = arith.constant 0 : index
    %26 = vector.load %arg1[%c24_30, %c1_31, %c0_32, %c0_33] : memref<32x3x16x40xf32, #tpu.memory_space<vmem>>, vector<8x1x16x40xf32>
    %27 = vector.shape_cast %26 : vector<8x1x16x40xf32> to vector<8x16x40xf32>
    %cst_34 = arith.constant dense<0xFF800000> : vector<8x40xf32>
    %28 = vector.multi_reduction <maximumf>, %27, %cst_34 [1] : vector<8x16x40xf32> to vector<8x40xf32>
    %29 = tpu.concatenate %19, %22, %25, %28 in 0 : vector<8x40xf32>, vector<8x40xf32>, vector<8x40xf32>, vector<8x40xf32> -> vector<32x40xf32>
    %30 = vector.extract_strided_slice %29 {offsets = [0, 1], sizes = [32, 39], strides = [1, 1]} : vector<32x40xf32> to vector<32x39xf32>
    %cst_35 = arith.constant 0xFF800000 : f32
    %31 = vector.broadcast %cst_35 : f32 to vector<32x1xf32>
    %32 = tpu.concatenate %30, %31 in 1 : vector<32x39xf32>, vector<32x1xf32> -> vector<32x40xf32>
    %33 = arith.maximumf %29, %32 : vector<32x40xf32>
    %c0_36 = arith.constant 0 : index
    %c2 = arith.constant 2 : index
    %c0_37 = arith.constant 0 : index
    %c0_38 = arith.constant 0 : index
    %34 = vector.load %arg1[%c0_36, %c2, %c0_37, %c0_38] : memref<32x3x16x40xf32, #tpu.memory_space<vmem>>, vector<8x1x16x40xf32>
    %35 = vector.shape_cast %34 : vector<8x1x16x40xf32> to vector<8x16x40xf32>
    %cst_39 = arith.constant dense<0xFF800000> : vector<8x40xf32>
    %36 = vector.multi_reduction <maximumf>, %35, %cst_39 [1] : vector<8x16x40xf32> to vector<8x40xf32>
    %c8_40 = arith.constant 8 : index
    %c2_41 = arith.constant 2 : index
    %c0_42 = arith.constant 0 : index
    %c0_43 = arith.constant 0 : index
    %37 = vector.load %arg1[%c8_40, %c2_41, %c0_42, %c0_43] : memref<32x3x16x40xf32, #tpu.memory_space<vmem>>, vector<8x1x16x40xf32>
    %38 = vector.shape_cast %37 : vector<8x1x16x40xf32> to vector<8x16x40xf32>
    %cst_44 = arith.constant dense<0xFF800000> : vector<8x40xf32>
    %39 = vector.multi_reduction <maximumf>, %38, %cst_44 [1] : vector<8x16x40xf32> to vector<8x40xf32>
    %c16_45 = arith.constant 16 : index
    %c2_46 = arith.constant 2 : index
    %c0_47 = arith.constant 0 : index
    %c0_48 = arith.constant 0 : index
    %40 = vector.load %arg1[%c16_45, %c2_46, %c0_47, %c0_48] : memref<32x3x16x40xf32, #tpu.memory_space<vmem>>, vector<8x1x16x40xf32>
    %41 = vector.shape_cast %40 : vector<8x1x16x40xf32> to vector<8x16x40xf32>
    %cst_49 = arith.constant dense<0xFF800000> : vector<8x40xf32>
    %42 = vector.multi_reduction <maximumf>, %41, %cst_49 [1] : vector<8x16x40xf32> to vector<8x40xf32>
    %c24_50 = arith.constant 24 : index
    %c2_51 = arith.constant 2 : index
    %c0_52 = arith.constant 0 : index
    %c0_53 = arith.constant 0 : index
    %43 = vector.load %arg1[%c24_50, %c2_51, %c0_52, %c0_53] : memref<32x3x16x40xf32, #tpu.memory_space<vmem>>, vector<8x1x16x40xf32>
    %44 = vector.shape_cast %43 : vector<8x1x16x40xf32> to vector<8x16x40xf32>
    %cst_54 = arith.constant dense<0xFF800000> : vector<8x40xf32>
    %45 = vector.multi_reduction <maximumf>, %44, %cst_54 [1] : vector<8x16x40xf32> to vector<8x40xf32>
    %46 = tpu.concatenate %36, %39, %42, %45 in 0 : vector<8x40xf32>, vector<8x40xf32>, vector<8x40xf32>, vector<8x40xf32> -> vector<32x40xf32>
    %47 = vector.extract_strided_slice %46 {offsets = [0, 1], sizes = [32, 39], strides = [1, 1]} : vector<32x40xf32> to vector<32x39xf32>
    %cst_55 = arith.constant 0xFF800000 : f32
    %48 = vector.broadcast %cst_55 : f32 to vector<32x1xf32>
    %49 = tpu.concatenate %47, %48 in 1 : vector<32x39xf32>, vector<32x1xf32> -> vector<32x40xf32>
    %50 = arith.maximumf %46, %49 : vector<32x40xf32>
    %cst_56 = arith.constant 0.000000e+00 : f32
    %51 = vector.broadcast %cst_56 : f32 to vector<32x2xf32>
    %52 = vector.extract_strided_slice %16 {offsets = [0, 0], sizes = [32, 38], strides = [1, 1]} : vector<32x40xf32> to vector<32x38xf32>
    %53 = tpu.concatenate %51, %52 in 1 : vector<32x2xf32>, vector<32x38xf32> -> vector<32x40xf32>
    %54 = vector.extract_strided_slice %33 {offsets = [0, 0], sizes = [32, 38], strides = [1, 1]} : vector<32x40xf32> to vector<32x38xf32>
    %55 = tpu.concatenate %51, %54 in 1 : vector<32x2xf32>, vector<32x38xf32> -> vector<32x40xf32>
    %56 = vector.extract_strided_slice %50 {offsets = [0, 0], sizes = [32, 38], strides = [1, 1]} : vector<32x40xf32> to vector<32x38xf32>
    %57 = tpu.concatenate %51, %56 in 1 : vector<32x2xf32>, vector<32x38xf32> -> vector<32x40xf32>
    %58 = vector.extract_strided_slice %16 {offsets = [0, 2], sizes = [32, 38], strides = [1, 1]} : vector<32x40xf32> to vector<32x38xf32>
    %59 = tpu.concatenate %58, %51 in 1 : vector<32x38xf32>, vector<32x2xf32> -> vector<32x40xf32>
    %60 = vector.extract_strided_slice %33 {offsets = [0, 2], sizes = [32, 38], strides = [1, 1]} : vector<32x40xf32> to vector<32x38xf32>
    %61 = tpu.concatenate %60, %51 in 1 : vector<32x38xf32>, vector<32x2xf32> -> vector<32x40xf32>
    %62 = vector.extract_strided_slice %50 {offsets = [0, 2], sizes = [32, 38], strides = [1, 1]} : vector<32x40xf32> to vector<32x38xf32>
    %63 = tpu.concatenate %62, %51 in 1 : vector<32x38xf32>, vector<32x2xf32> -> vector<32x40xf32>
    %cst_57 = arith.constant 0.000000e+00 : f32
    %64 = vector.broadcast %cst_57 : f32 to vector<32x40xf32>
    %c0_58 = arith.constant 0 : index
    %65 = memref.load %arg2[%c0_58] : memref<42xf32, #tpu.memory_space<smem>>
    %66 = vector.broadcast %65 : f32 to vector<32x40xf32>
    %67 = arith.mulf %66, %53 : vector<32x40xf32>
    %68 = arith.addf %64, %67 : vector<32x40xf32>
    %c1_59 = arith.constant 1 : index
    %69 = memref.load %arg2[%c1_59] : memref<42xf32, #tpu.memory_space<smem>>
    %70 = vector.broadcast %69 : f32 to vector<32x40xf32>
    %71 = arith.mulf %70, %16 : vector<32x40xf32>
    %72 = arith.addf %68, %71 : vector<32x40xf32>
    %c2_60 = arith.constant 2 : index
    %73 = memref.load %arg2[%c2_60] : memref<42xf32, #tpu.memory_space<smem>>
    %74 = vector.broadcast %73 : f32 to vector<32x40xf32>
    %75 = arith.mulf %74, %59 : vector<32x40xf32>
    %76 = arith.addf %72, %75 : vector<32x40xf32>
    %c3 = arith.constant 3 : index
    %77 = memref.load %arg2[%c3] : memref<42xf32, #tpu.memory_space<smem>>
    %78 = vector.broadcast %77 : f32 to vector<32x40xf32>
    %79 = arith.mulf %78, %55 : vector<32x40xf32>
    %80 = arith.addf %76, %79 : vector<32x40xf32>
    %c4 = arith.constant 4 : index
    %81 = memref.load %arg2[%c4] : memref<42xf32, #tpu.memory_space<smem>>
    %82 = vector.broadcast %81 : f32 to vector<32x40xf32>
    %83 = arith.mulf %82, %33 : vector<32x40xf32>
    %84 = arith.addf %80, %83 : vector<32x40xf32>
    %c5 = arith.constant 5 : index
    %85 = memref.load %arg2[%c5] : memref<42xf32, #tpu.memory_space<smem>>
    %86 = vector.broadcast %85 : f32 to vector<32x40xf32>
    %87 = arith.mulf %86, %61 : vector<32x40xf32>
    %88 = arith.addf %84, %87 : vector<32x40xf32>
    %c6 = arith.constant 6 : index
    %89 = memref.load %arg2[%c6] : memref<42xf32, #tpu.memory_space<smem>>
    %90 = vector.broadcast %89 : f32 to vector<32x40xf32>
    %91 = arith.mulf %90, %57 : vector<32x40xf32>
    %92 = arith.addf %88, %91 : vector<32x40xf32>
    %c7 = arith.constant 7 : index
    %93 = memref.load %arg2[%c7] : memref<42xf32, #tpu.memory_space<smem>>
    %94 = vector.broadcast %93 : f32 to vector<32x40xf32>
    %95 = arith.mulf %94, %50 : vector<32x40xf32>
    %96 = arith.addf %92, %95 : vector<32x40xf32>
    %c8_61 = arith.constant 8 : index
    %97 = memref.load %arg2[%c8_61] : memref<42xf32, #tpu.memory_space<smem>>
    %98 = vector.broadcast %97 : f32 to vector<32x40xf32>
    %99 = arith.mulf %98, %63 : vector<32x40xf32>
    %100 = arith.addf %96, %99 : vector<32x40xf32>
    %c27 = arith.constant 27 : index
    %101 = memref.load %arg2[%c27] : memref<42xf32, #tpu.memory_space<smem>>
    %102 = vector.broadcast %101 : f32 to vector<32x40xf32>
    %103 = arith.addf %100, %102 : vector<32x40xf32>
    %cst_62 = arith.constant 0.000000e+00 : f32
    %104 = vector.broadcast %cst_62 : f32 to vector<32x40xf32>
    %105 = arith.maximumf %103, %104 : vector<32x40xf32>
    %cst_63 = arith.constant 0.000000e+00 : f32
    %106 = vector.broadcast %cst_63 : f32 to vector<32x40xf32>
    %c9 = arith.constant 9 : index
    %107 = memref.load %arg2[%c9] : memref<42xf32, #tpu.memory_space<smem>>
    %108 = vector.broadcast %107 : f32 to vector<32x40xf32>
    %109 = arith.mulf %108, %53 : vector<32x40xf32>
    %110 = arith.addf %106, %109 : vector<32x40xf32>
    %c10 = arith.constant 10 : index
    %111 = memref.load %arg2[%c10] : memref<42xf32, #tpu.memory_space<smem>>
    %112 = vector.broadcast %111 : f32 to vector<32x40xf32>
    %113 = arith.mulf %112, %16 : vector<32x40xf32>
    %114 = arith.addf %110, %113 : vector<32x40xf32>
    %c11 = arith.constant 11 : index
    %115 = memref.load %arg2[%c11] : memref<42xf32, #tpu.memory_space<smem>>
    %116 = vector.broadcast %115 : f32 to vector<32x40xf32>
    %117 = arith.mulf %116, %59 : vector<32x40xf32>
    %118 = arith.addf %114, %117 : vector<32x40xf32>
    %c12 = arith.constant 12 : index
    %119 = memref.load %arg2[%c12] : memref<42xf32, #tpu.memory_space<smem>>
    %120 = vector.broadcast %119 : f32 to vector<32x40xf32>
    %121 = arith.mulf %120, %55 : vector<32x40xf32>
    %122 = arith.addf %118, %121 : vector<32x40xf32>
    %c13 = arith.constant 13 : index
    %123 = memref.load %arg2[%c13] : memref<42xf32, #tpu.memory_space<smem>>
    %124 = vector.broadcast %123 : f32 to vector<32x40xf32>
    %125 = arith.mulf %124, %33 : vector<32x40xf32>
    %126 = arith.addf %122, %125 : vector<32x40xf32>
    %c14 = arith.constant 14 : index
    %127 = memref.load %arg2[%c14] : memref<42xf32, #tpu.memory_space<smem>>
    %128 = vector.broadcast %127 : f32 to vector<32x40xf32>
    %129 = arith.mulf %128, %61 : vector<32x40xf32>
    %130 = arith.addf %126, %129 : vector<32x40xf32>
    %c15 = arith.constant 15 : index
    %131 = memref.load %arg2[%c15] : memref<42xf32, #tpu.memory_space<smem>>
    %132 = vector.broadcast %131 : f32 to vector<32x40xf32>
    %133 = arith.mulf %132, %57 : vector<32x40xf32>
    %134 = arith.addf %130, %133 : vector<32x40xf32>
    %c16_64 = arith.constant 16 : index
    %135 = memref.load %arg2[%c16_64] : memref<42xf32, #tpu.memory_space<smem>>
    %136 = vector.broadcast %135 : f32 to vector<32x40xf32>
    %137 = arith.mulf %136, %50 : vector<32x40xf32>
    %138 = arith.addf %134, %137 : vector<32x40xf32>
    %c17 = arith.constant 17 : index
    %139 = memref.load %arg2[%c17] : memref<42xf32, #tpu.memory_space<smem>>
    %140 = vector.broadcast %139 : f32 to vector<32x40xf32>
    %141 = arith.mulf %140, %63 : vector<32x40xf32>
    %142 = arith.addf %138, %141 : vector<32x40xf32>
    %c28 = arith.constant 28 : index
    %143 = memref.load %arg2[%c28] : memref<42xf32, #tpu.memory_space<smem>>
    %144 = vector.broadcast %143 : f32 to vector<32x40xf32>
    %145 = arith.addf %142, %144 : vector<32x40xf32>
    %cst_65 = arith.constant 0.000000e+00 : f32
    %146 = vector.broadcast %cst_65 : f32 to vector<32x40xf32>
    %147 = arith.maximumf %145, %146 : vector<32x40xf32>
    %cst_66 = arith.constant 0.000000e+00 : f32
    %148 = vector.broadcast %cst_66 : f32 to vector<32x40xf32>
    %c18 = arith.constant 18 : index
    %149 = memref.load %arg2[%c18] : memref<42xf32, #tpu.memory_space<smem>>
    %150 = vector.broadcast %149 : f32 to vector<32x40xf32>
    %151 = arith.mulf %150, %53 : vector<32x40xf32>
    %152 = arith.addf %148, %151 : vector<32x40xf32>
    %c19 = arith.constant 19 : index
    %153 = memref.load %arg2[%c19] : memref<42xf32, #tpu.memory_space<smem>>
    %154 = vector.broadcast %153 : f32 to vector<32x40xf32>
    %155 = arith.mulf %154, %16 : vector<32x40xf32>
    %156 = arith.addf %152, %155 : vector<32x40xf32>
    %c20 = arith.constant 20 : index
    %157 = memref.load %arg2[%c20] : memref<42xf32, #tpu.memory_space<smem>>
    %158 = vector.broadcast %157 : f32 to vector<32x40xf32>
    %159 = arith.mulf %158, %59 : vector<32x40xf32>
    %160 = arith.addf %156, %159 : vector<32x40xf32>
    %c21 = arith.constant 21 : index
    %161 = memref.load %arg2[%c21] : memref<42xf32, #tpu.memory_space<smem>>
    %162 = vector.broadcast %161 : f32 to vector<32x40xf32>
    %163 = arith.mulf %162, %55 : vector<32x40xf32>
    %164 = arith.addf %160, %163 : vector<32x40xf32>
    %c22 = arith.constant 22 : index
    %165 = memref.load %arg2[%c22] : memref<42xf32, #tpu.memory_space<smem>>
    %166 = vector.broadcast %165 : f32 to vector<32x40xf32>
    %167 = arith.mulf %166, %33 : vector<32x40xf32>
    %168 = arith.addf %164, %167 : vector<32x40xf32>
    %c23 = arith.constant 23 : index
    %169 = memref.load %arg2[%c23] : memref<42xf32, #tpu.memory_space<smem>>
    %170 = vector.broadcast %169 : f32 to vector<32x40xf32>
    %171 = arith.mulf %170, %61 : vector<32x40xf32>
    %172 = arith.addf %168, %171 : vector<32x40xf32>
    %c24_67 = arith.constant 24 : index
    %173 = memref.load %arg2[%c24_67] : memref<42xf32, #tpu.memory_space<smem>>
    %174 = vector.broadcast %173 : f32 to vector<32x40xf32>
    %175 = arith.mulf %174, %57 : vector<32x40xf32>
    %176 = arith.addf %172, %175 : vector<32x40xf32>
    %c25 = arith.constant 25 : index
    %177 = memref.load %arg2[%c25] : memref<42xf32, #tpu.memory_space<smem>>
    %178 = vector.broadcast %177 : f32 to vector<32x40xf32>
    %179 = arith.mulf %178, %50 : vector<32x40xf32>
    %180 = arith.addf %176, %179 : vector<32x40xf32>
    %c26 = arith.constant 26 : index
    %181 = memref.load %arg2[%c26] : memref<42xf32, #tpu.memory_space<smem>>
    %182 = vector.broadcast %181 : f32 to vector<32x40xf32>
    %183 = arith.mulf %182, %63 : vector<32x40xf32>
    %184 = arith.addf %180, %183 : vector<32x40xf32>
    %c29 = arith.constant 29 : index
    %185 = memref.load %arg2[%c29] : memref<42xf32, #tpu.memory_space<smem>>
    %186 = vector.broadcast %185 : f32 to vector<32x40xf32>
    %187 = arith.addf %184, %186 : vector<32x40xf32>
    %cst_68 = arith.constant 0.000000e+00 : f32
    %188 = vector.broadcast %cst_68 : f32 to vector<32x40xf32>
    %189 = arith.maximumf %187, %188 : vector<32x40xf32>
    %cst_69 = arith.constant 0.000000e+00 : f32
    %190 = vector.broadcast %cst_69 : f32 to vector<32x40xf32>
    %c30 = arith.constant 30 : index
    %191 = memref.load %arg2[%c30] : memref<42xf32, #tpu.memory_space<smem>>
    %192 = vector.broadcast %191 : f32 to vector<32x40xf32>
    %193 = arith.mulf %192, %105 : vector<32x40xf32>
    %194 = arith.addf %190, %193 : vector<32x40xf32>
    %c31 = arith.constant 31 : index
    %195 = memref.load %arg2[%c31] : memref<42xf32, #tpu.memory_space<smem>>
    %196 = vector.broadcast %195 : f32 to vector<32x40xf32>
    %197 = arith.mulf %196, %147 : vector<32x40xf32>
    %198 = arith.addf %194, %197 : vector<32x40xf32>
    %c32 = arith.constant 32 : index
    %199 = memref.load %arg2[%c32] : memref<42xf32, #tpu.memory_space<smem>>
    %200 = vector.broadcast %199 : f32 to vector<32x40xf32>
    %201 = arith.mulf %200, %189 : vector<32x40xf32>
    %202 = arith.addf %198, %201 : vector<32x40xf32>
    %c39 = arith.constant 39 : index
    %203 = memref.load %arg2[%c39] : memref<42xf32, #tpu.memory_space<smem>>
    %204 = vector.broadcast %203 : f32 to vector<32x40xf32>
    %205 = arith.addf %202, %204 : vector<32x40xf32>
    %cst_70 = arith.constant 0.000000e+00 : f32
    %206 = vector.broadcast %cst_70 : f32 to vector<32x40xf32>
    %207 = arith.maximumf %205, %206 : vector<32x40xf32>
    %c0_71 = arith.constant 0 : index
    %c0_72 = arith.constant 0 : index
    %c0_73 = arith.constant 0 : index
    %c0_74 = arith.constant 0 : index
    %208 = vector.load %arg3[%c0_71, %c0_72, %c0_73, %c0_74] : memref<1x3x32x40xf32, #tpu.memory_space<vmem>>, vector<1x1x32x40xf32>
    %209 = vector.shape_cast %208 : vector<1x1x32x40xf32> to vector<32x40xf32>
    %210 = vector.shape_cast %207 : vector<32x40xf32> to vector<1x1x32x40xf32>
    tpu.vector_store %arg3[%c0_71, %c0_72, %c0_73, %c0_74], %210 {strides = array<i32>} : memref<1x3x32x40xf32, #tpu.memory_space<vmem>>, vector<1x1x32x40xf32>,
    %cst_75 = arith.constant 0.000000e+00 : f32
    %211 = vector.broadcast %cst_75 : f32 to vector<32x40xf32>
    %c33 = arith.constant 33 : index
    %212 = memref.load %arg2[%c33] : memref<42xf32, #tpu.memory_space<smem>>
    %213 = vector.broadcast %212 : f32 to vector<32x40xf32>
    %214 = arith.mulf %213, %105 : vector<32x40xf32>
    %215 = arith.addf %211, %214 : vector<32x40xf32>
    %c34 = arith.constant 34 : index
    %216 = memref.load %arg2[%c34] : memref<42xf32, #tpu.memory_space<smem>>
    %217 = vector.broadcast %216 : f32 to vector<32x40xf32>
    %218 = arith.mulf %217, %147 : vector<32x40xf32>
    %219 = arith.addf %215, %218 : vector<32x40xf32>
    %c35 = arith.constant 35 : index
    %220 = memref.load %arg2[%c35] : memref<42xf32, #tpu.memory_space<smem>>
    %221 = vector.broadcast %220 : f32 to vector<32x40xf32>
    %222 = arith.mulf %221, %189 : vector<32x40xf32>
    %223 = arith.addf %219, %222 : vector<32x40xf32>
    %c40 = arith.constant 40 : index
    %224 = memref.load %arg2[%c40] : memref<42xf32, #tpu.memory_space<smem>>
    %225 = vector.broadcast %224 : f32 to vector<32x40xf32>
    %226 = arith.addf %223, %225 : vector<32x40xf32>
    %cst_76 = arith.constant 0.000000e+00 : f32
    %227 = vector.broadcast %cst_76 : f32 to vector<32x40xf32>
    %228 = arith.maximumf %226, %227 : vector<32x40xf32>
    %c0_77 = arith.constant 0 : index
    %c1_78 = arith.constant 1 : index
    %c0_79 = arith.constant 0 : index
    %c0_80 = arith.constant 0 : index
    %229 = vector.load %arg3[%c0_77, %c1_78, %c0_79, %c0_80] : memref<1x3x32x40xf32, #tpu.memory_space<vmem>>, vector<1x1x32x40xf32>
    %230 = vector.shape_cast %229 : vector<1x1x32x40xf32> to vector<32x40xf32>
    %231 = vector.shape_cast %228 : vector<32x40xf32> to vector<1x1x32x40xf32>
    tpu.vector_store %arg3[%c0_77, %c1_78, %c0_79, %c0_80], %231 {strides = array<i32>} : memref<1x3x32x40xf32, #tpu.memory_space<vmem>>, vector<1x1x32x40xf32>,
    %cst_81 = arith.constant 0.000000e+00 : f32
    %232 = vector.broadcast %cst_81 : f32 to vector<32x40xf32>
    %c36 = arith.constant 36 : index
    %233 = memref.load %arg2[%c36] : memref<42xf32, #tpu.memory_space<smem>>
    %234 = vector.broadcast %233 : f32 to vector<32x40xf32>
    %235 = arith.mulf %234, %105 : vector<32x40xf32>
    %236 = arith.addf %232, %235 : vector<32x40xf32>
    %c37 = arith.constant 37 : index
    %237 = memref.load %arg2[%c37] : memref<42xf32, #tpu.memory_space<smem>>
    %238 = vector.broadcast %237 : f32 to vector<32x40xf32>
    %239 = arith.mulf %238, %147 : vector<32x40xf32>
    %240 = arith.addf %236, %239 : vector<32x40xf32>
    %c38 = arith.constant 38 : index
    %241 = memref.load %arg2[%c38] : memref<42xf32, #tpu.memory_space<smem>>
    %242 = vector.broadcast %241 : f32 to vector<32x40xf32>
    %243 = arith.mulf %242, %189 : vector<32x40xf32>
    %244 = arith.addf %240, %243 : vector<32x40xf32>
    %c41 = arith.constant 41 : index
    %245 = memref.load %arg2[%c41] : memref<42xf32, #tpu.memory_space<smem>>
    %246 = vector.broadcast %245 : f32 to vector<32x40xf32>
    %247 = arith.addf %244, %246 : vector<32x40xf32>
    %cst_82 = arith.constant 0.000000e+00 : f32
    %248 = vector.broadcast %cst_82 : f32 to vector<32x40xf32>
    %249 = arith.maximumf %247, %248 : vector<32x40xf32>
    %c0_83 = arith.constant 0 : index
    %c2_84 = arith.constant 2 : index
    %c0_85 = arith.constant 0 : index
    %c0_86 = arith.constant 0 : index
    %250 = vector.load %arg3[%c0_83, %c2_84, %c0_85, %c0_86] : memref<1x3x32x40xf32, #tpu.memory_space<vmem>>, vector<1x1x32x40xf32>
    %251 = vector.shape_cast %250 : vector<1x1x32x40xf32> to vector<32x40xf32>
    %252 = vector.shape_cast %249 : vector<32x40xf32> to vector<1x1x32x40xf32>
    tpu.vector_store %arg3[%c0_83, %c2_84, %c0_85, %c0_86], %252 {strides = array<i32>} : memref<1x3x32x40xf32, #tpu.memory_space<vmem>>, vector<1x1x32x40xf32>,
    return
  }
  func.func @transform_0(%arg0: i32) -> (i32, i32, i32, i32) {
    %c0_i32 = arith.constant 0 : i32
    %c0_i32_0 = arith.constant 0 : i32
    %c0_i32_1 = arith.constant 0 : i32
    %c0_i32_2 = arith.constant 0 : i32
    return %arg0, %c0_i32, %c0_i32_0, %c0_i32_1 : i32, i32, i32, i32
  }
  func.func @transform_1(%arg0: i32) -> i32 {
    %c0_i32 = arith.constant 0 : i32
    %c0_i32_0 = arith.constant 0 : i32
    return %c0_i32 : i32
  }
  func.func @transform_2(%arg0: i32) -> (i32, i32, i32, i32) {
    %c0_i32 = arith.constant 0 : i32
    %c0_i32_0 = arith.constant 0 : i32
    %c0_i32_1 = arith.constant 0 : i32
    %c0_i32_2 = arith.constant 0 : i32
    return %arg0, %c0_i32, %c0_i32_0, %c0_i32_1 : i32, i32, i32, i32
  }
}

</mosaic_0001>

<bundles_post_ra>
// kernel: tpu_custom_call.1
= control target key start
LH: loop header
LB: loop body
LE: loop exit
PB: predicated region body
PF: predicated region fallthrough
CT: control target
= control target key end

     0   :  { %7 = vsyncpa [#allocation4], 0  ;;  %s3724_s0 = inlined_call_operand.vmem [shape: f32[64,3,16,40], index: 0, kind: input, shape index: {}]   ;;  %s3725_s1 = inlined_call_operand.vmem [shape: f32[42], index: 1, kind: input, shape index: {}]   ;;  %s3726_s2 = inlined_call_operand.hbm [shape: f32[2,3,32,40], index: 2, kind: output, shape index: {}]  }
   0x1   :  { %8 = vsyncpa [#allocation3], 0 }
   0x2   :  { %10 = vsyncpa [#allocation3 + $0x1], 0  ;;  %s2521_s9 = smov 0   ;;  %s2523_s10 = smov 0  }
   0x3   :  { %s2525_s11 = smov 0   ;;  %s2527_s12 = smov 0  }
   0x4 LB: > { %s2542_s13 = sadd.s32 4294967295, %s2498_s12   ;;  %s2123_s14 = sadd.s32 4294967294, %s2498_s12   ;;  %s2498_s12 = sphi %s2527_s12, %s3756_s12   ;;  %s2494_s11 = sphi %s2525_s11, %s3755_s11   ;;  %s2490_s10 = sphi %s2523_s10, %s3754_s10   ;;  %s2486_s9 = sphi %s2521_s9, %s3753_s9  }
   0x5   : > { %s2546_s15 = sadd.s32 1, %s2498_s12   ;;  %s70_s16 = sadd.s32 1, %s2494_s11 }
   0x6   : > { %s67_s17 = ssub.s32 %s2498_s12, %s2546_s15  ;;  %p80_p0 = scmp.ne.s32.totalorder %s2494_s11, %s2490_s10 }
   0x7   : > { %p68_p1 = scmp.eq.s32.totalorder %s67_s17, 0  ;;  %p81_p2 = scmp.eq.s32.totalorder %s2542_s13, 1 }
   0x8   : > { %p86_p3 = scmp.ne.s32.totalorder %s2490_s10, %s2486_s9  ;;  %p87_p4 = scmp.eq.s32.totalorder %s2123_s14, 1 }
   0x9   : > { %s2557_s18 = scalar_select %p68_p1, %s2494_s11, %s70_s16  }
   0xa   : > { %p2559_p5 = por %p81_p2, %p80_p0  ;;  %p2563_p6 = por %p87_p4, %p86_p3 }
   0xb   : > { %p2124_p7 = scmp.ge.s32.totalorder %s2498_s12, 1  ;;  %p94_p8 = scmp.lt.s32.totalorder %s2498_s12, 3 }
   0xc   : > { %p2376_p9 = scmp.eq.s32.totalorder %s2542_s13, 0  ;;  %s106_s23 = sshll.u32 %s3725_s1, 4  ;;  %s107_s23 = int_to_ptr.vmem [resolvable:$true] %s106_s23 }
   0xd   : > { %p95_p10 = pnand %p2124_p7, %p94_p8  ;;  %s2500_s24 = smov [#allocation2]  }
   0xf   : > { %p2368_p11 = pneg %p95_p10  ;;  %129 = sbr.rel (%p95_p10) target bundleno = 523 (0x20b), region = 28 }
  0x11   : > { %p2369_p12 = pnand %p2376_p9, %p2368_p11 }
  0x13   : > { %2371 = dma.vmem_to_smem (!%p2369_p12), %s107_s23, 16, %s2500_s24, [#allocation4]  }
  0x14   : > { %2477 = dma.done.wait (%p2376_p9), [#allocation4], 16  }
  0x15   : > { %2479 = vsyncadd (%p2376_p9), [#allocation4], 4294967280 }
  0x16   : > { %136 = sfence }
  0x17   : > { %s2129_s25 = sshll.u32 %s2542_s13, 5  ;;  %vm177_vm0 = vcmask 326656   ;;  %vm525_vm1 = vcmask 1041409   ;;  %vm527_vm2 = vcmask 1042434   ;;  %vm529_vm3 = vcmask 1043459   ;;  %s2501_s30 = smov 127  }
  0x18   : > { %p155_p13 = scmp.lt.s32.totalorder %s2129_s25, 63  ;;  %vm531_vm4 = vcmask 1044484   ;;  %vm533_vm5 = vcmask 1045509   ;;  %vm535_vm6 = vcmask 1046534   ;;  %vm537_vm7 = vcmask 1047559   ;;  %s2502_s3 = smov 2  }
  0x19   : > { %vm600_vm8 = vcmask 318464   ;;  %s2503_s4 = smov 126   ;;  %s2307_s5 = sld [smem:[#allocation2 + $0x1]]  ;;  %vm1505_vm9 = vcmask 15360   ;;  %vm1562_vm10 = vcmask 310272  }
  0x1a   : > { %s3758_s25 = smov (!%p155_p13, %s2129_s25), 63  ;;  %s2317_s6 = sld [smem:[#allocation2 + $0xa]] }
  0x1b   : > { %s2360_s26 = smul.u32 48, %s3758_s25  ;;  %s2327_s7 = sld [smem:[#allocation2 + $0x13]] }
  0x1c   : > { %s2310_s8 = sld [smem:[#allocation2 + $0x4]] }
  0x1d   : > { %s2577_s29 = scalar_lea.vmem %s3724_s0, %s2360_s26  ;;  %s2320_s14 = sld [smem:[#allocation2 + $0xd]] }
  0x1e   : > { %v2147_v0 = vld [vmem:[%s2577_s29 + $0x300] sm:$0xff]  ;;  %v2148_v1 = vld [vmem:[%s2577_s29 + $0x308] sm:$0xff]  ;;  %v2149_v2 = vld [vmem:[%s2577_s29 + $0x330] sm:$0xff]  ;;  %s2330_s16 = sld [smem:[#allocation2 + $0x16]] }
  0x1f   : > { %v2150_v3 = vld [vmem:[%s2577_s29 + $0x338] sm:$0xff]  ;;  %v2151_v4 = vld [vmem:[%s2577_s29 + $0x360] sm:$0xff]  ;;  %v2152_v5 = vld [vmem:[%s2577_s29 + $0x368] sm:$0xff]  ;;  %v356_v6 = vsel %vm177_vm0, %v2147_v0, -inf  ;;  %v357_v7 = vsel %vm177_vm0, %v2148_v1, -inf  ;;  %v365_v8 = vsel %vm177_vm0, %v2149_v2, -inf }
  0x20   : > { %v2153_v9 = vld [vmem:[%s2577_s29 + $0x390] sm:$0xff]  ;;  %v2154_v10 = vld [vmem:[%s2577_s29 + $0x398] sm:$0xff]  ;;  %v2155_v11 = vld [vmem:[%s2577_s29 + $0x3c0] sm:$0xff]  ;;  %v358_v12 = vmax.f32 %v356_v6, %v357_v7  ;;  %v366_v13 = vsel %vm177_vm0, %v2150_v3, -inf  ;;  %v374_v14 = vsel %vm177_vm0, %v2151_v4, -inf  ;;  %v375_v15 = vsel %vm177_vm0, %v2152_v5, -inf }
  0x21   : > { %v2156_v16 = vld [vmem:[%s2577_s29 + $0x3c8] sm:$0xff]  ;;  %v2157_v17 = vld [vmem:[%s2577_s29 + $0x3f0] sm:$0xff]  ;;  %v2158_v18 = vld [vmem:[%s2577_s29 + $0x3f8] sm:$0xff]  ;;  %v367_v19 = vmax.f32 %v365_v8, %v366_v13  ;;  %v376_v20 = vmax.f32 %v374_v14, %v375_v15  ;;  %v383_v21 = vsel %vm177_vm0, %v2153_v9, -inf  ;;  %v384_v22 = vsel %vm177_vm0, %v2154_v10, -inf  ;;  %s1599_s17 = sld [smem:[#allocation2]] }
  0x22   : > { %v2159_v23 = vld [vmem:[%s2577_s29 + $0x420] sm:$0xff]  ;;  %v359_v24 = vrot.slane %v358_v12, 4  ;;  %v385_v25 = vmax.f32 %v383_v21, %v384_v22  ;;  %v392_v26 = vsel %vm177_vm0, %v2155_v11, -inf  ;;  %v393_v27 = vsel %vm177_vm0, %v2156_v16, -inf  ;;  %v2160_v28 = vld [vmem:[%s2577_s29 + $0x428] sm:$0xff]  ;;  %v2161_v29 = vld [vmem:[%s2577_s29 + $0x450] sm:$0xff] }
  0x23   : > { %v368_v30 = vrot.slane %v367_v19, 4  ;;  %v377_v31 = vrot.slane %v376_v20, 4  ;;  %v394_v32 = vmax.f32 %v392_v26, %v393_v27  ;;  %v401_v33 = vsel %vm177_vm0, %v2157_v17, -inf  ;;  %v2162_v38 = vld [vmem:[%s2577_s29 + $0x458] sm:$0xff]  ;;  %v161_v3 = vld [vmem:[%s2577_s29] sm:$0xff]  ;;  %v162_v8 = vld [vmem:[%s2577_s29 + $0x8] sm:$0xff] }
  0x24   : > { %v360_v34 = vmax.f32 %v358_v12, %v359_v24  ;;  %v386_v35 = vrot.slane %v385_v25, 4  ;;  %v402_v36 = vsel %vm177_vm0, %v2158_v18, -inf  ;;  %v410_v37 = vsel %vm177_vm0, %v2159_v23, -inf  ;;  %v163_v16 = vld [vmem:[%s2577_s29 + $0x30] sm:$0xff]  ;;  %v164_v17 = vld [vmem:[%s2577_s29 + $0x38] sm:$0xff]  ;;  %v165_v26 = vld [vmem:[%s2577_s29 + $0x60] sm:$0xff] }
  0x25   : > { %v369_v39 = vmax.f32 %v367_v19, %v368_v30  ;;  %v378_v40 = vmax.f32 %v376_v20, %v377_v31  ;;  %v395_v41 = vrot.slane %v394_v32, 4  ;;  %v403_v42 = vmax.f32 %v401_v33, %v402_v36  ;;  %v166_v27 = vld [vmem:[%s2577_s29 + $0x68] sm:$0xff]  ;;  %v167_v36 = vld [vmem:[%s2577_s29 + $0x90] sm:$0xff]  ;;  %s3192_s21 = sld [smem:[#allocation2 + $0x9]] }
  0x26   : > { %v361_v43 = vrot.slane %v360_v34, 2  ;;  %v387_v44 = vmax.f32 %v385_v25, %v386_v35  ;;  %v411_v45 = vsel %vm177_vm0, %v2160_v28, -inf  ;;  %v419_v46 = vsel %vm177_vm0, %v2161_v29, -inf  ;;  %s3194_s22 = sld [smem:[#allocation2 + $0x12]] }
  0x27   : > { %v370_v47 = vrot.slane %v369_v39, 2  ;;  %v379_v48 = vrot.slane %v378_v40, 2  ;;  %v396_v49 = vmax.f32 %v394_v32, %v395_v41  ;;  %v404_v50 = vrot.slane %v403_v42, 4  ;;  %s3198_s23 = sld [smem:[#allocation2 + $0x2]] }
  0x28   : > { %v362_v51 = vmax.f32 %v360_v34, %v361_v43  ;;  %v388_v52 = vrot.slane %v387_v44, 2  ;;  %v412_v53 = vmax.f32 %v410_v37, %v411_v45  ;;  %v420_v54 = vsel %vm177_vm0, %v2162_v38, -inf  ;;  %v168_v37 = vld [vmem:[%s2577_s29 + $0x98] sm:$0xff]  ;;  %v169_v38 = vld [vmem:[%s2577_s29 + $0xc0] sm:$0xff]  ;;  %s3200_s24 = sld [smem:[#allocation2 + $0xb]] }
  0x29   : > { %v371_v55 = vmax.f32 %v369_v39, %v370_v47  ;;  %v380_v56 = vmax.f32 %v378_v40, %v379_v48  ;;  %v397_v57 = vrot.slane %v396_v49, 2  ;;  %v405_v58 = vmax.f32 %v403_v42, %v404_v50  ;;  %v171_v47 = vld [vmem:[%s2577_s29 + $0xf0] sm:$0xff]  ;;  %s3202_s25 = sld [smem:[#allocation2 + $0x14]] }
  0x2a   : > { %v363_v59 = vrot.slane %v362_v51, 1  ;;  %v389_v60 = vmax.f32 %v387_v44, %v388_v52  ;;  %v413_v61 = vrot.slane %v412_v53, 4  ;;  %v421_v62 = vmax.f32 %v419_v46, %v420_v54  ;;  %v170_v46 = vld [vmem:[%s2577_s29 + $0xc8] sm:$0xff]  ;;  %s3206_s26 = sld [smem:[#allocation2 + $0x3]] }
  0x2b   : > { %v372_v63 = vrot.slane %v371_v55, 1  ;;  %v381_v0 = vrot.slane %v380_v56, 1  ;;  %v398_v1 = vmax.f32 %v396_v49, %v397_v57  ;;  %v406_v2 = vrot.slane %v405_v58, 2  ;;  %v173_v57 = vld [vmem:[%s2577_s29 + $0x120] sm:$0xff]  ;;  %s3213_s27 = sld [smem:[#allocation2 + $0xc]] }
  0x2c   : > { %v364_v4 = vmax.f32 %v362_v51, %v363_v59  ;;  %v390_v5 = vrot.slane %v389_v60, 1  ;;  %v414_v6 = vmax.f32 %v412_v53, %v413_v61  ;;  %v422_v7 = vrot.slane %v421_v62, 4  ;;  %s3222_s28 = sld [smem:[#allocation2 + $0x15]] }
  0x2d   : > { %v373_v9 = vmax.f32 %v371_v55, %v372_v63  ;;  %v382_v10 = vmax.f32 %v380_v56, %v381_v0  ;;  %v399_v11 = vrot.slane %v398_v1, 1  ;;  %v407_v12 = vmax.f32 %v405_v58, %v406_v2  ;;  %v172_v56 = vld [vmem:[%s2577_s29 + $0xf8] sm:$0xff]  ;;  %v175_v2 = vld [vmem:[%s2577_s29 + $0x150] sm:$0xff] }
  0x2e   : > { %v391_v13 = vmax.f32 %v389_v60, %v390_v5  ;;  %v415_v14 = vrot.slane %v414_v6, 2  ;;  %v423_v15 = vmax.f32 %v421_v62, %v422_v7  ;;  %v178_v18 = vsel %vm177_vm0, %v161_v3, -inf }
  0x2f   : > { %v400_v19 = vmax.f32 %v398_v1, %v399_v11  ;;  %v408_v20 = vrot.slane %v407_v12, 1  ;;  %v564_v21 = vsel %vm525_vm1, %v373_v9, %v364_v4  ;;  %v179_v22 = vsel %vm177_vm0, %v162_v8, -inf  ;;  %v174_v1 = vld [vmem:[%s2577_s29 + $0x128] sm:$0xff] }
  0x30   : > { %v416_v23 = vmax.f32 %v414_v6, %v415_v14  ;;  %v424_v24 = vrot.slane %v423_v15, 2  ;;  %v565_v25 = vsel %vm527_vm2, %v382_v10, %v564_v21  ;;  %v180_v28 = vmax.f32 %v178_v18, %v179_v22  ;;  %v176_v10 = vld [vmem:[%s2577_s29 + $0x158] sm:$0xff] }
  0x31   : > { %v409_v29 = vmax.f32 %v407_v12, %v408_v20  ;;  %v566_v30 = vsel %vm529_vm3, %v391_v13, %v565_v25  ;;  %v187_v31 = vsel %vm177_vm0, %v163_v16, -inf  ;;  %v188_v32 = vsel %vm177_vm0, %v164_v17, -inf }
  0x32   : > { %v417_v33 = vrot.slane %v416_v23, 1  ;;  %v425_v34 = vmax.f32 %v423_v15, %v424_v24  ;;  %v567_v35 = vsel %vm531_vm4, %v400_v19, %v566_v30  ;;  %v181_v39 = vrot.slane %v180_v28, 4 }
  0x33   : > { %v568_v40 = vsel %vm533_vm5, %v409_v29, %v567_v35  ;;  %v189_v41 = vmax.f32 %v187_v31, %v188_v32  ;;  %v196_v42 = vsel %vm177_vm0, %v165_v26, -inf  ;;  %v197_v43 = vsel %vm177_vm0, %v166_v27, -inf  ;;  %v2164_v32 = vld [vmem:[%s2577_s29 + $0x488] sm:$0xff] }
  0x34   : > { %v418_v44 = vmax.f32 %v416_v23, %v417_v33  ;;  %v426_v45 = vrot.slane %v425_v34, 1  ;;  %v182_v48 = vmax.f32 %v180_v28, %v181_v39  ;;  %v198_v49 = vmax.f32 %v196_v42, %v197_v43  ;;  %v2163_v23 = vld [vmem:[%s2577_s29 + $0x480] sm:$0xff] }
  0x35   : > { %v190_v50 = vrot.slane %v189_v41, 4  ;;  %v205_v51 = vsel %vm177_vm0, %v167_v36, -inf  ;;  %v206_v52 = vsel %vm177_vm0, %v168_v37, -inf  ;;  %v214_v53 = vsel %vm177_vm0, %v169_v38, -inf }
  0x36   : > { %v427_v54 = vmax.f32 %v425_v34, %v426_v45  ;;  %v569_v55 = vsel %vm535_vm6, %v418_v44, %v568_v40  ;;  %v183_v58 = vrot.slane %v182_v48, 2  ;;  %v199_v59 = vrot.slane %v198_v49, 4  ;;  %v2166_v45 = vld [vmem:[%s2577_s29 + $0x4b8] sm:$0xff] }
  0x37   : > { %v191_v60 = vmax.f32 %v189_v41, %v190_v50  ;;  %v207_v61 = vmax.f32 %v205_v51, %v206_v52  ;;  %v215_v62 = vsel %vm177_vm0, %v170_v46, -inf  ;;  %v223_v63 = vsel %vm177_vm0, %v171_v47, -inf  ;;  %v2165_v41 = vld [vmem:[%s2577_s29 + $0x4b0] sm:$0xff] }
  0x38   : > { %v2642_v0 = vsel %vm537_vm7, %v427_v54, %v569_v55  ;;  %v184_v3 = vmax.f32 %v182_v48, %v183_v58  ;;  %v200_v4 = vmax.f32 %v198_v49, %v199_v59  ;;  %v216_v5 = vmax.f32 %v214_v53, %v215_v62  ;;  %v2167_v53 = vld [vmem:[%s2577_s29 + $0x4e0] sm:$0xff]  ;;  %v2168_v59 = vld [vmem:[%s2577_s29 + $0x4e8] sm:$0xff] }
  0x39   : > { %592 = vrot.lane.b32.xlu1 %v2642_v0, %s2501_s30  ;;  %v192_v6 = vrot.slane %v191_v60, 2  ;;  %v208_v7 = vrot.slane %v207_v61, 4  ;;  %v224_v8 = vsel %vm177_vm0, %v172_v56, -inf  ;;  %v232_v9 = vsel %vm177_vm0, %v173_v57, -inf }
  0x3a   : > { %v185_v11 = vrot.slane %v184_v3, 1  ;;  %v201_v12 = vrot.slane %v200_v4, 2  ;;  %v217_v13 = vrot.slane %v216_v5, 4  ;;  %v225_v14 = vmax.f32 %v223_v63, %v224_v8  ;;  %v2169_v63 = vld [vmem:[%s2577_s29 + $0x510] sm:$0xff] }
  0x3b   : > { %v193_v15 = vmax.f32 %v191_v60, %v192_v6  ;;  %v209_v16 = vmax.f32 %v207_v61, %v208_v7  ;;  %v233_v17 = vsel %vm177_vm0, %v174_v1, -inf  ;;  %v241_v18 = vsel %vm177_vm0, %v175_v2, -inf  ;;  %v2170_v6 = vld [vmem:[%s2577_s29 + $0x518] sm:$0xff] }
  0x3c   : > { %v186_v19 = vmax.f32 %v184_v3, %v185_v11  ;;  %v202_v20 = vmax.f32 %v200_v4, %v201_v12  ;;  %v218_v21 = vmax.f32 %v216_v5, %v217_v13  ;;  %v226_v22 = vrot.slane %v225_v14, 4 }
  0x3d   : > { %v194_v24 = vrot.slane %v193_v15, 1  ;;  %v210_v25 = vrot.slane %v209_v16, 2  ;;  %v234_v26 = vmax.f32 %v232_v9, %v233_v17  ;;  %v242_v27 = vsel %vm177_vm0, %v176_v10, -inf  ;;  %v2171_v9 = vld [vmem:[%s2577_s29 + $0x540] sm:$0xff] }
  0x3e   : > { %v203_v28 = vrot.slane %v202_v20, 1  ;;  %v219_v29 = vrot.slane %v218_v21, 2  ;;  %v227_v30 = vmax.f32 %v225_v14, %v226_v22  ;;  %v243_v31 = vmax.f32 %v241_v18, %v242_v27 }
  0x3f   : > { %v195_v33 = vmax.f32 %v193_v15, %v194_v24  ;;  %v211_v34 = vmax.f32 %v209_v16, %v210_v25  ;;  %v235_v35 = vrot.slane %v234_v26, 4  ;;  %v445_v36 = vsel %vm177_vm0, %v2163_v23, -inf  ;;  %v2172_v15 = vld [vmem:[%s2577_s29 + $0x548] sm:$0xff]  ;;  %v2173_v23 = vld [vmem:[%s2577_s29 + $0x570] sm:$0xff]  ;;  %v2174_v24 = vld [vmem:[%s2577_s29 + $0x578] sm:$0xff] }
  0x40   : > { %v204_v37 = vmax.f32 %v202_v20, %v203_v28  ;;  %v220_v38 = vmax.f32 %v218_v21, %v219_v29  ;;  %v228_v39 = vrot.slane %v227_v30, 2  ;;  %v244_v40 = vrot.slane %v243_v31, 4 }
  0x41   : > { %v212_v42 = vrot.slane %v211_v34, 1  ;;  %v236_v43 = vmax.f32 %v234_v26, %v235_v35  ;;  %v526_v44 = vsel %vm525_vm1, %v195_v33, %v186_v19  ;;  %v446_v46 = vsel %vm177_vm0, %v2164_v32, -inf  ;;  %v2175_v33 = vld [vmem:[%s2577_s29 + $0x5a0] sm:$0xff] }
  0x42   : > { %v221_v47 = vrot.slane %v220_v38, 1  ;;  %v229_v48 = vmax.f32 %v227_v30, %v228_v39  ;;  %v245_v49 = vmax.f32 %v243_v31, %v244_v40  ;;  %v528_v50 = vsel %vm527_vm2, %v204_v37, %v526_v44 }
  0x43   : > { %v213_v51 = vmax.f32 %v211_v34, %v212_v42  ;;  %v237_v52 = vrot.slane %v236_v43, 2  ;;  %v447_v54 = vmax.f32 %v445_v36, %v446_v46  ;;  %v454_v55 = vsel %vm177_vm0, %v2165_v41, -inf  ;;  %v2176_v34 = vld [vmem:[%s2577_s29 + $0x5a8] sm:$0xff]  ;;  %v2177_v42 = vld [vmem:[%s2577_s29 + $0x5d0] sm:$0xff] }
  0x44   : > { %v222_v56 = vmax.f32 %v220_v38, %v221_v47  ;;  %v230_v57 = vrot.slane %v229_v48, 1  ;;  %v246_v58 = vrot.slane %v245_v49, 2  ;;  %v455_v60 = vsel %vm177_vm0, %v2166_v45, -inf }
  0x45   : > { %v238_v61 = vmax.f32 %v236_v43, %v237_v52  ;;  %v530_v62 = vsel %vm529_vm3, %v213_v51, %v528_v50  ;;  %v448_v1 = vrot.slane %v447_v54, 4  ;;  %v456_v2 = vmax.f32 %v454_v55, %v455_v60  ;;  %v2178_v43 = vld [vmem:[%s2577_s29 + $0x5d8] sm:$0xff] }
  0x46   : > { %v231_v3 = vmax.f32 %v229_v48, %v230_v57  ;;  %v247_v4 = vmax.f32 %v245_v49, %v246_v58  ;;  %v532_v5 = vsel %vm531_vm4, %v222_v56, %v530_v62  ;;  %v463_v7 = vsel %vm177_vm0, %v2167_v53, -inf  ;;  %v2131_v56 = vld [vmem:[%s2577_s29 + $0x180] sm:$0xff] }
  0x47   : > { %v239_v8 = vrot.slane %v238_v61, 1  ;;  %v449_v10 = vmax.f32 %v447_v54, %v448_v1  ;;  %v457_v11 = vrot.slane %v456_v2, 4  ;;  %v464_v12 = vsel %vm177_vm0, %v2168_v59, -inf }
  0x48   : > { %v248_v13 = vrot.slane %v247_v4, 1  ;;  %v534_v14 = vsel %vm533_vm5, %v231_v3, %v532_v5  ;;  %v465_v16 = vmax.f32 %v463_v7, %v464_v12  ;;  %v472_v17 = vsel %vm177_vm0, %v2169_v63, -inf  ;;  %v2133_v3 = vld [vmem:[%s2577_s29 + $0x1b0] sm:$0xff]  ;;  %v2134_v12 = vld [vmem:[%s2577_s29 + $0x1b8] sm:$0xff] }
  0x49   : > { %v240_v18 = vmax.f32 %v238_v61, %v239_v8  ;;  %v450_v19 = vrot.slane %v449_v10, 2  ;;  %v458_v20 = vmax.f32 %v456_v2, %v457_v11  ;;  %v473_v21 = vsel %vm177_vm0, %v2170_v6, -inf  ;;  %v2132_v2 = vld [vmem:[%s2577_s29 + $0x188] sm:$0xff] }
  0x4a   : > { %v249_v22 = vmax.f32 %v247_v4, %v248_v13  ;;  %v466_v25 = vrot.slane %v465_v16, 4  ;;  %v474_v26 = vmax.f32 %v472_v17, %v473_v21  ;;  %v481_v27 = vsel %vm177_vm0, %v2171_v9, -inf  ;;  %v2135_v21 = vld [vmem:[%s2577_s29 + $0x1e0] sm:$0xff] }
  0x4b   : > { %v536_v28 = vsel %vm535_vm6, %v240_v18, %v534_v14  ;;  %v451_v29 = vmax.f32 %v449_v10, %v450_v19  ;;  %v459_v30 = vrot.slane %v458_v20, 2  ;;  %v482_v31 = vsel %vm177_vm0, %v2172_v15, -inf }
  0x4c   : > { %v2683_v32 = vsel %vm537_vm7, %v249_v22, %v536_v28  ;;  %v467_v35 = vmax.f32 %v465_v16, %v466_v25  ;;  %v475_v36 = vrot.slane %v474_v26, 4  ;;  %v483_v37 = vmax.f32 %v481_v27, %v482_v31 }
  0x4d   : > { %588 = vrot.lane.b32.xlu0 %v2683_v32, %s2501_s30  ;;  %v452_v38 = vrot.slane %v451_v29, 1  ;;  %v460_v39 = vmax.f32 %v458_v20, %v459_v30  ;;  %v490_v40 = vsel %vm177_vm0, %v2173_v23, -inf  ;;  %v491_v41 = vsel %vm177_vm0, %v2174_v24, -inf  ;;  %v2136_v24 = vld [vmem:[%s2577_s29 + $0x1e8] sm:$0xff] }
  0x4e   : > { %v468_v44 = vrot.slane %v467_v35, 2  ;;  %v476_v45 = vmax.f32 %v474_v26, %v475_v36  ;;  %v484_v46 = vrot.slane %v483_v37, 4  ;;  %v492_v47 = vmax.f32 %v490_v40, %v491_v41 }
  0x4f   : > { %v453_v48 = vmax.f32 %v451_v29, %v452_v38  ;;  %v461_v49 = vrot.slane %v460_v39, 1  ;;  %v499_v50 = vsel %vm177_vm0, %v2175_v33, -inf  ;;  %v500_v51 = vsel %vm177_vm0, %v2176_v34, -inf  ;;  %v2137_v34 = vld [vmem:[%s2577_s29 + $0x210] sm:$0xff] }
  0x50   : > { %v469_v52 = vmax.f32 %v467_v35, %v468_v44  ;;  %v477_v53 = vrot.slane %v476_v45, 2  ;;  %v485_v54 = vmax.f32 %v483_v37, %v484_v46  ;;  %v493_v55 = vrot.slane %v492_v47, 4  ;;  %v2138_v35 = vld [vmem:[%s2577_s29 + $0x218] sm:$0xff]  ;;  %v2139_v44 = vld [vmem:[%s2577_s29 + $0x240] sm:$0xff] }
  0x51   : > { %v462_v57 = vmax.f32 %v460_v39, %v461_v49  ;;  %v501_v58 = vmax.f32 %v499_v50, %v500_v51  ;;  %v508_v59 = vsel %vm177_vm0, %v2177_v42, -inf  ;;  %v509_v60 = vsel %vm177_vm0, %v2178_v43, -inf }
  0x52   : > { %v470_v61 = vrot.slane %v469_v52, 1  ;;  %v478_v62 = vmax.f32 %v476_v45, %v477_v53  ;;  %v486_v63 = vrot.slane %v485_v54, 2  ;;  %v494_v1 = vmax.f32 %v492_v47, %v493_v55  ;;  %v2140_v45 = vld [vmem:[%s2577_s29 + $0x248] sm:$0xff] }
  0x53   : > { %v502_v4 = vrot.slane %v501_v58, 4  ;;  %v510_v5 = vmax.f32 %v508_v59, %v509_v60  ;;  %v580_v6 = vsel %vm525_vm1, %v462_v57, %v453_v48  ;;  %v267_v7 = vsel %vm177_vm0, %v2131_v56, -inf  ;;  %v2142_v57 = vld [vmem:[%s2577_s29 + $0x278] sm:$0xff] }
  0x54   : > { %v471_v8 = vmax.f32 %v469_v52, %v470_v61  ;;  %v479_v9 = vrot.slane %v478_v62, 1  ;;  %v487_v10 = vmax.f32 %v485_v54, %v486_v63  ;;  %v495_v11 = vrot.slane %v494_v1, 2  ;;  %v2141_v54 = vld [vmem:[%s2577_s29 + $0x270] sm:$0xff] }
  0x55   : > { %v503_v13 = vmax.f32 %v501_v58, %v502_v4  ;;  %v511_v14 = vrot.slane %v510_v5, 4  ;;  %v268_v15 = vsel %vm177_vm0, %v2132_v2, -inf  ;;  %v276_v16 = vsel %vm177_vm0, %v2133_v3, -inf  ;;  %v2143_v3 = vld [vmem:[%s2577_s29 + $0x2a0] sm:$0xff]  ;;  %v2144_v4 = vld [vmem:[%s2577_s29 + $0x2a8] sm:$0xff] }
  0x56   : > { %v480_v17 = vmax.f32 %v478_v62, %v479_v9  ;;  %v488_v18 = vrot.slane %v487_v10, 1  ;;  %v496_v19 = vmax.f32 %v494_v1, %v495_v11  ;;  %v581_v20 = vsel %vm527_vm2, %v471_v8, %v580_v6 }
  0x57   : > { %v504_v22 = vrot.slane %v503_v13, 2  ;;  %v512_v23 = vmax.f32 %v510_v5, %v511_v14  ;;  %v269_v25 = vmax.f32 %v267_v7, %v268_v15  ;;  %v277_v26 = vsel %vm177_vm0, %v2134_v12, -inf  ;;  %v2146_v14 = vld [vmem:[%s2577_s29 + $0x2d8] sm:$0xff] }
  0x58   : > { %v489_v27 = vmax.f32 %v487_v10, %v488_v18  ;;  %v497_v28 = vrot.slane %v496_v19, 1  ;;  %v582_v29 = vsel %vm529_vm3, %v480_v17, %v581_v20  ;;  %v278_v30 = vmax.f32 %v276_v16, %v277_v26 }
  0x59   : > { %v505_v31 = vmax.f32 %v503_v13, %v504_v22  ;;  %v513_v33 = vrot.slane %v512_v23, 2  ;;  %v270_v36 = vrot.slane %v269_v25, 4  ;;  %v285_v37 = vsel %vm177_vm0, %v2135_v21, -inf  ;;  %v2145_v13 = vld [vmem:[%s2577_s29 + $0x2d0] sm:$0xff] }
  0x5a   : > { %v498_v38 = vmax.f32 %v496_v19, %v497_v28  ;;  %v583_v39 = vsel %vm531_vm4, %v489_v27, %v582_v29  ;;  %v279_v40 = vrot.slane %v278_v30, 4  ;;  %v286_v41 = vsel %vm177_vm0, %v2136_v24, -inf  ;;  %v2227_v27 = vld [vmem:[%s2577_s29 + $0x490] sm:$0xff] }
  0x5b   : > { %v506_v42 = vrot.slane %v505_v31, 1  ;;  %v514_v43 = vmax.f32 %v512_v23, %v513_v33  ;;  %v271_v46 = vmax.f32 %v269_v25, %v270_v36  ;;  %v287_v47 = vmax.f32 %v285_v37, %v286_v41  ;;  %v2228_v37 = vld [vmem:[%s2577_s29 + $0x498] sm:$0xff] }
  0x5c   : > { %v584_v48 = vsel %vm533_vm5, %v498_v38, %v583_v39  ;;  %v280_v49 = vmax.f32 %v278_v30, %v279_v40  ;;  %v294_v50 = vsel %vm177_vm0, %v2137_v34, -inf  ;;  %v295_v51 = vsel %vm177_vm0, %v2138_v35, -inf  ;;  %v2229_v38 = vld [vmem:[%s2577_s29 + $0x4c0] sm:$0xff] }
  0x5d   : > { %v507_v52 = vmax.f32 %v505_v31, %v506_v42  ;;  %v515_v53 = vrot.slane %v514_v43, 1  ;;  %v272_v55 = vrot.slane %v271_v46, 2  ;;  %v288_v56 = vrot.slane %v287_v47, 4 }
  0x5e   : > { %v281_v58 = vrot.slane %v280_v49, 2  ;;  %v296_v59 = vmax.f32 %v294_v50, %v295_v51  ;;  %v303_v60 = vsel %vm177_vm0, %v2139_v44, -inf  ;;  %v304_v61 = vsel %vm177_vm0, %v2140_v45, -inf }
  0x5f   : > { %v516_v62 = vmax.f32 %v514_v43, %v515_v53  ;;  %v585_v63 = vsel %vm535_vm6, %v507_v52, %v584_v48  ;;  %v273_v1 = vmax.f32 %v271_v46, %v272_v55  ;;  %v289_v2 = vmax.f32 %v287_v47, %v288_v56  ;;  %v2230_v47 = vld [vmem:[%s2577_s29 + $0x4c8] sm:$0xff]  ;;  %v2231_v48 = vld [vmem:[%s2577_s29 + $0x4f0] sm:$0xff] }
  0x60   : > { %v282_v5 = vmax.f32 %v280_v49, %v281_v58  ;;  %v297_v6 = vrot.slane %v296_v59, 4  ;;  %v305_v7 = vmax.f32 %v303_v60, %v304_v61  ;;  %v312_v8 = vsel %vm177_vm0, %v2141_v54, -inf }
  0x61   : > { %v2729_v9 = vsel %vm537_vm7, %v516_v62, %v585_v63  ;;  %v274_v10 = vrot.slane %v273_v1, 1  ;;  %v290_v11 = vrot.slane %v289_v2, 2  ;;  %v313_v12 = vsel %vm177_vm0, %v2142_v57, -inf  ;;  %v2232_v57 = vld [vmem:[%s2577_s29 + $0x4f8] sm:$0xff] }
  0x62   : > { %594 = vrot.lane.b32.xlu1 %v2729_v9, %s2501_s30  ;;  %v283_v15 = vrot.slane %v282_v5, 1  ;;  %v298_v16 = vmax.f32 %v296_v59, %v297_v6  ;;  %v306_v17 = vrot.slane %v305_v7, 4  ;;  %v314_v18 = vmax.f32 %v312_v8, %v313_v12 }
  0x63   : > { %v275_v19 = vmax.f32 %v273_v1, %v274_v10  ;;  %v291_v20 = vmax.f32 %v289_v2, %v290_v11  ;;  %v321_v21 = vsel %vm177_vm0, %v2143_v3, -inf  ;;  %v322_v22 = vsel %vm177_vm0, %v2144_v4, -inf  ;;  %v2233_v3 = vld [vmem:[%s2577_s29 + $0x520] sm:$0xff] }
  0x64   : > { %v284_v23 = vmax.f32 %v282_v5, %v283_v15  ;;  %v299_v24 = vrot.slane %v298_v16, 2  ;;  %v307_v25 = vmax.f32 %v305_v7, %v306_v17  ;;  %v315_v26 = vrot.slane %v314_v18, 4  ;;  %v2234_v5 = vld [vmem:[%s2577_s29 + $0x528] sm:$0xff]  ;;  %v2235_v15 = vld [vmem:[%s2577_s29 + $0x550] sm:$0xff] }
  0x65   : > { %v292_v28 = vrot.slane %v291_v20, 1  ;;  %v323_v29 = vmax.f32 %v321_v21, %v322_v22  ;;  %v330_v30 = vsel %vm177_vm0, %v2145_v13, -inf  ;;  %v331_v31 = vsel %vm177_vm0, %v2146_v14, -inf }
  0x66   : > { %v300_v33 = vmax.f32 %v298_v16, %v299_v24  ;;  %v308_v34 = vrot.slane %v307_v25, 2  ;;  %v316_v35 = vmax.f32 %v314_v18, %v315_v26  ;;  %v332_v36 = vmax.f32 %v330_v30, %v331_v31  ;;  %v2236_v16 = vld [vmem:[%s2577_s29 + $0x558] sm:$0xff]  ;;  %v2238_v30 = vld [vmem:[%s2577_s29 + $0x588] sm:$0xff] }
  0x67   : > { %v293_v39 = vmax.f32 %v291_v20, %v292_v28  ;;  %v324_v40 = vrot.slane %v323_v29, 4  ;;  %v548_v41 = vsel %vm525_vm1, %v284_v23, %v275_v19  ;;  %v893_v42 = vsel %vm177_vm0, %v2227_v27, -inf }
  0x68   : > { %v301_v43 = vrot.slane %v300_v33, 1  ;;  %v309_v44 = vmax.f32 %v307_v25, %v308_v34  ;;  %v317_v45 = vrot.slane %v316_v35, 2  ;;  %v333_v46 = vrot.slane %v332_v36, 4  ;;  %v2237_v25 = vld [vmem:[%s2577_s29 + $0x580] sm:$0xff] }
  0x69   : > { %v325_v49 = vmax.f32 %v323_v29, %v324_v40  ;;  %v549_v50 = vsel %vm527_vm2, %v293_v39, %v548_v41  ;;  %v894_v51 = vsel %vm177_vm0, %v2228_v37, -inf  ;;  %v902_v52 = vsel %vm177_vm0, %v2229_v38, -inf  ;;  %v2240_v41 = vld [vmem:[%s2577_s29 + $0x5b8] sm:$0xff] }
  0x6a   : > { %v302_v53 = vmax.f32 %v300_v33, %v301_v43  ;;  %v310_v54 = vrot.slane %v309_v44, 1  ;;  %v318_v55 = vmax.f32 %v316_v35, %v317_v45  ;;  %v334_v56 = vmax.f32 %v332_v36, %v333_v46  ;;  %v2239_v36 = vld [vmem:[%s2577_s29 + $0x5b0] sm:$0xff] }
  0x6b   : > { %v326_v58 = vrot.slane %v325_v49, 2  ;;  %v895_v59 = vmax.f32 %v893_v42, %v894_v51  ;;  %v903_v60 = vsel %vm177_vm0, %v2230_v47, -inf  ;;  %v911_v61 = vsel %vm177_vm0, %v2231_v48, -inf }
  0x6c   : > { %v311_v62 = vmax.f32 %v309_v44, %v310_v54  ;;  %v319_v63 = vrot.slane %v318_v55, 1  ;;  %v335_v1 = vrot.slane %v334_v56, 2  ;;  %v550_v2 = vsel %vm529_vm3, %v302_v53, %v549_v50  ;;  %v2242_v50 = vld [vmem:[%s2577_s29 + $0x5e8] sm:$0xff] }
  0x6d   : > { %v327_v4 = vmax.f32 %v325_v49, %v326_v58  ;;  %v896_v6 = vrot.slane %v895_v59, 4  ;;  %v904_v7 = vmax.f32 %v902_v52, %v903_v60  ;;  %v912_v8 = vsel %vm177_vm0, %v2232_v57, -inf  ;;  %v2241_v49 = vld [vmem:[%s2577_s29 + $0x5e0] sm:$0xff] }
  0x6e   : > { %v320_v10 = vmax.f32 %v318_v55, %v319_v63  ;;  %v336_v11 = vmax.f32 %v334_v56, %v335_v1  ;;  %v551_v12 = vsel %vm531_vm4, %v311_v62, %v550_v2  ;;  %v913_v13 = vmax.f32 %v911_v61, %v912_v8  ;;  %v2211_v63 = vld [vmem:[%s2577_s29 + $0x310] sm:$0xff] }
  0x6f   : > { %v328_v14 = vrot.slane %v327_v4, 1  ;;  %v897_v17 = vmax.f32 %v895_v59, %v896_v6  ;;  %v905_v18 = vrot.slane %v904_v7, 4  ;;  %v920_v19 = vsel %vm177_vm0, %v2233_v3, -inf }
  0x70   : > { %v337_v20 = vrot.slane %v336_v11, 1  ;;  %v552_v21 = vsel %vm533_vm5, %v320_v10, %v551_v12  ;;  %v914_v22 = vrot.slane %v913_v13, 4  ;;  %v921_v23 = vsel %vm177_vm0, %v2234_v5, -inf  ;;  %v2212_v10 = vld [vmem:[%s2577_s29 + $0x318] sm:$0xff] }
  0x71   : > { %v329_v24 = vmax.f32 %v327_v4, %v328_v14  ;;  %v898_v26 = vrot.slane %v897_v17, 2  ;;  %v906_v27 = vmax.f32 %v904_v7, %v905_v18  ;;  %v922_v28 = vmax.f32 %v920_v19, %v921_v23 }
  0x72   : > { %v338_v29 = vmax.f32 %v336_v11, %v337_v20  ;;  %v915_v31 = vmax.f32 %v913_v13, %v914_v22  ;;  %v929_v33 = vsel %vm177_vm0, %v2235_v15, -inf  ;;  %v930_v34 = vsel %vm177_vm0, %v2236_v16, -inf  ;;  %v2213_v11 = vld [vmem:[%s2577_s29 + $0x340] sm:$0xff]  ;;  %v2214_v20 = vld [vmem:[%s2577_s29 + $0x348] sm:$0xff] }
  0x73   : > { %v553_v35 = vsel %vm535_vm6, %v329_v24, %v552_v21  ;;  %v899_v37 = vmax.f32 %v897_v17, %v898_v26  ;;  %v907_v38 = vrot.slane %v906_v27, 2  ;;  %v923_v39 = vrot.slane %v922_v28, 4  ;;  %v2215_v21 = vld [vmem:[%s2577_s29 + $0x370] sm:$0xff] }
  0x74   : > { %v2770_v40 = vsel %vm537_vm7, %v338_v29, %v553_v35  ;;  %v916_v42 = vrot.slane %v915_v31, 2  ;;  %v931_v43 = vmax.f32 %v929_v33, %v930_v34  ;;  %v938_v44 = vsel %vm177_vm0, %v2237_v25, -inf  ;;  %v2216_v29 = vld [vmem:[%s2577_s29 + $0x378] sm:$0xff] }
  0x75   : > { %590 = vrot.lane.b32.xlu0 %v2770_v40, %s2501_s30  ;;  %v900_v45 = vrot.slane %v899_v37, 1  ;;  %v908_v46 = vmax.f32 %v906_v27, %v907_v38  ;;  %v924_v47 = vmax.f32 %v922_v28, %v923_v39  ;;  %v939_v48 = vsel %vm177_vm0, %v2238_v30, -inf  ;;  %v2217_v30 = vld [vmem:[%s2577_s29 + $0x3a0] sm:$0xff] }
  0x76   : > { %v917_v51 = vmax.f32 %v915_v31, %v916_v42  ;;  %v932_v52 = vrot.slane %v931_v43, 4  ;;  %v940_v53 = vmax.f32 %v938_v44, %v939_v48  ;;  %v947_v54 = vsel %vm177_vm0, %v2239_v36, -inf }
  0x77   : > { %v901_v55 = vmax.f32 %v899_v37, %v900_v45  ;;  %v909_v56 = vrot.slane %v908_v46, 1  ;;  %v925_v57 = vrot.slane %v924_v47, 2  ;;  %v948_v58 = vsel %vm177_vm0, %v2240_v41, -inf  ;;  %v2218_v41 = vld [vmem:[%s2577_s29 + $0x3a8] sm:$0xff] }
  0x78   : > { %v918_v59 = vrot.slane %v917_v51, 1  ;;  %v933_v60 = vmax.f32 %v931_v43, %v932_v52  ;;  %v941_v61 = vrot.slane %v940_v53, 4  ;;  %v949_v62 = vmax.f32 %v947_v54, %v948_v58 }
  0x79   : > { %v910_v1 = vmax.f32 %v908_v46, %v909_v56  ;;  %v926_v2 = vmax.f32 %v924_v47, %v925_v57  ;;  %v956_v3 = vsel %vm177_vm0, %v2241_v49, -inf  ;;  %v957_v4 = vsel %vm177_vm0, %v2242_v50, -inf  ;;  %v2219_v50 = vld [vmem:[%s2577_s29 + $0x3d0] sm:$0xff] }
  0x7a   : > { %v919_v5 = vmax.f32 %v917_v51, %v918_v59  ;;  %v934_v6 = vrot.slane %v933_v60, 2  ;;  %v942_v7 = vmax.f32 %v940_v53, %v941_v61  ;;  %v950_v8 = vrot.slane %v949_v62, 4  ;;  %v2220_v53 = vld [vmem:[%s2577_s29 + $0x3d8] sm:$0xff] }
  0x7b   : > { %v927_v12 = vrot.slane %v926_v2, 1  ;;  %v958_v13 = vmax.f32 %v956_v3, %v957_v4  ;;  %v1021_v14 = vsel %vm525_vm1, %v910_v1, %v901_v55  ;;  %v804_v15 = vsel %vm177_vm0, %v2211_v63, -inf  ;;  %v2222_v63 = vld [vmem:[%s2577_s29 + $0x408] sm:$0xff] }
  0x7c   : > { %v935_v16 = vmax.f32 %v933_v60, %v934_v6  ;;  %v943_v17 = vrot.slane %v942_v7, 2  ;;  %v951_v18 = vmax.f32 %v949_v62, %v950_v8  ;;  %v1022_v19 = vsel %vm527_vm2, %v919_v5, %v1021_v14  ;;  %v2221_v62 = vld [vmem:[%s2577_s29 + $0x400] sm:$0xff]  ;;  %v2224_v14 = vld [vmem:[%s2577_s29 + $0x438] sm:$0xff] }
  0x7d   : > { %v928_v22 = vmax.f32 %v926_v2, %v927_v12  ;;  %v959_v23 = vrot.slane %v958_v13, 4  ;;  %v805_v24 = vsel %vm177_vm0, %v2212_v10, -inf  ;;  %v813_v25 = vsel %vm177_vm0, %v2213_v11, -inf  ;;  %v2223_v10 = vld [vmem:[%s2577_s29 + $0x430] sm:$0xff] }
  0x7e   : > { %v936_v26 = vrot.slane %v935_v16, 1  ;;  %v944_v27 = vmax.f32 %v942_v7, %v943_v17  ;;  %v952_v28 = vrot.slane %v951_v18, 2  ;;  %v806_v31 = vmax.f32 %v804_v15, %v805_v24  ;;  %v2226_v24 = vld [vmem:[%s2577_s29 + $0x468] sm:$0xff] }
  0x7f   : > { %v960_v33 = vmax.f32 %v958_v13, %v959_v23  ;;  %v1023_v34 = vsel %vm529_vm3, %v928_v22, %v1022_v19  ;;  %v814_v35 = vsel %vm177_vm0, %v2214_v20, -inf  ;;  %v822_v36 = vsel %vm177_vm0, %v2215_v21, -inf  ;;  %v2225_v20 = vld [vmem:[%s2577_s29 + $0x460] sm:$0xff] }
  0x80   : > { %v937_v37 = vmax.f32 %v935_v16, %v936_v26  ;;  %v945_v38 = vrot.slane %v944_v27, 1  ;;  %v953_v39 = vmax.f32 %v951_v18, %v952_v28  ;;  %v807_v42 = vrot.slane %v806_v31, 4 }
  0x81   : > { %v961_v43 = vrot.slane %v960_v33, 2  ;;  %v815_v44 = vmax.f32 %v813_v25, %v814_v35  ;;  %v823_v45 = vsel %vm177_vm0, %v2216_v29, -inf  ;;  %v831_v46 = vsel %vm177_vm0, %v2217_v30, -inf }
  0x82   : > { %v946_v47 = vmax.f32 %v944_v27, %v945_v38  ;;  %v954_v48 = vrot.slane %v953_v39, 1  ;;  %v1024_v49 = vsel %vm531_vm4, %v937_v37, %v1023_v34  ;;  %v808_v51 = vmax.f32 %v806_v31, %v807_v42  ;;  %v2179_v38 = vld [vmem:[%s2577_s29 + $0x10] sm:$0xff] }
  0x83   : > { %v962_v52 = vmax.f32 %v960_v33, %v961_v43  ;;  %v816_v54 = vrot.slane %v815_v44, 4  ;;  %v824_v55 = vmax.f32 %v822_v36, %v823_v45  ;;  %v832_v56 = vsel %vm177_vm0, %v2218_v41, -inf }
  0x84   : > { %v955_v57 = vmax.f32 %v953_v39, %v954_v48  ;;  %v1025_v58 = vsel %vm533_vm5, %v946_v47, %v1024_v49  ;;  %v809_v59 = vrot.slane %v808_v51, 2  ;;  %v833_v60 = vmax.f32 %v831_v46, %v832_v56  ;;  %v2180_v48 = vld [vmem:[%s2577_s29 + $0x18] sm:$0xff]  ;;  %v2181_v49 = vld [vmem:[%s2577_s29 + $0x40] sm:$0xff] }
  0x85   : > { %v963_v61 = vrot.slane %v962_v52, 1  ;;  %v817_v1 = vmax.f32 %v815_v44, %v816_v54  ;;  %v825_v2 = vrot.slane %v824_v55, 4  ;;  %v840_v3 = vsel %vm177_vm0, %v2219_v50, -inf }
  0x86   : > { %v1026_v4 = vsel %vm535_vm6, %v955_v57, %v1025_v58  ;;  %v810_v5 = vmax.f32 %v808_v51, %v809_v59  ;;  %v834_v6 = vrot.slane %v833_v60, 4  ;;  %v841_v7 = vsel %vm177_vm0, %v2220_v53, -inf  ;;  %v2182_v58 = vld [vmem:[%s2577_s29 + $0x48] sm:$0xff]  ;;  %v2183_v59 = vld [vmem:[%s2577_s29 + $0x70] sm:$0xff] }
  0x87   : > { %v964_v8 = vmax.f32 %v962_v52, %v963_v61  ;;  %v818_v11 = vrot.slane %v817_v1, 2  ;;  %v826_v12 = vmax.f32 %v824_v55, %v825_v2  ;;  %v842_v13 = vmax.f32 %v840_v3, %v841_v7 }
  0x88   : > { %v811_v15 = vrot.slane %v810_v5, 1  ;;  %v835_v16 = vmax.f32 %v833_v60, %v834_v6  ;;  %v849_v17 = vsel %vm177_vm0, %v2221_v62, -inf  ;;  %v850_v18 = vsel %vm177_vm0, %v2222_v63, -inf  ;;  %v2185_v6 = vld [vmem:[%s2577_s29 + $0xa0] sm:$0xff] }
  0x89   : > { %v2816_v19 = vsel %vm537_vm7, %v964_v8, %v1026_v4  ;;  %v819_v21 = vmax.f32 %v817_v1, %v818_v11  ;;  %v827_v22 = vrot.slane %v826_v12, 2  ;;  %v843_v23 = vrot.slane %v842_v13, 4 }
  0x8a   : > { %1035 = vrot.lane.b32.xlu1 %v2816_v19, %s2501_s30  ;;  %v812_v25 = vmax.f32 %v810_v5, %v811_v15  ;;  %v836_v26 = vrot.slane %v835_v16, 2  ;;  %v851_v27 = vmax.f32 %v849_v17, %v850_v18  ;;  %v858_v28 = vsel %vm177_vm0, %v2223_v10, -inf  ;;  %v2184_v5 = vld [vmem:[%s2577_s29 + $0x78] sm:$0xff]  ;;  %v2186_v15 = vld [vmem:[%s2577_s29 + $0xa8] sm:$0xff] }
  0x8b   : > { %v820_v29 = vrot.slane %v819_v21, 1  ;;  %v828_v30 = vmax.f32 %v826_v12, %v827_v22  ;;  %v844_v31 = vmax.f32 %v842_v13, %v843_v23  ;;  %v859_v33 = vsel %vm177_vm0, %v2224_v14, -inf }
  0x8c   : > { %v837_v34 = vmax.f32 %v835_v16, %v836_v26  ;;  %v852_v35 = vrot.slane %v851_v27, 4  ;;  %v860_v36 = vmax.f32 %v858_v28, %v859_v33  ;;  %v867_v37 = vsel %vm177_vm0, %v2225_v20, -inf  ;;  %v2187_v16 = vld [vmem:[%s2577_s29 + $0xd0] sm:$0xff]  ;;  %v2188_v26 = vld [vmem:[%s2577_s29 + $0xd8] sm:$0xff] }
  0x8d   : > { %v821_v39 = vmax.f32 %v819_v21, %v820_v29  ;;  %v829_v41 = vrot.slane %v828_v30, 1  ;;  %v845_v42 = vrot.slane %v844_v31, 2  ;;  %v868_v43 = vsel %vm177_vm0, %v2226_v24, -inf }
  0x8e   : > { %v838_v44 = vrot.slane %v837_v34, 1  ;;  %v853_v45 = vmax.f32 %v851_v27, %v852_v35  ;;  %v861_v46 = vrot.slane %v860_v36, 4  ;;  %v869_v47 = vmax.f32 %v867_v37, %v868_v43 }
  0x8f   : > { %v830_v50 = vmax.f32 %v828_v30, %v829_v41  ;;  %v846_v51 = vmax.f32 %v844_v31, %v845_v42  ;;  %v1005_v52 = vsel %vm525_vm1, %v821_v39, %v812_v25  ;;  %v626_v53 = vsel %vm177_vm0, %v2179_v38, -inf  ;;  %v2190_v38 = vld [vmem:[%s2577_s29 + $0x108] sm:$0xff] }
  0x90   : > { %v839_v54 = vmax.f32 %v837_v34, %v838_v44  ;;  %v854_v55 = vrot.slane %v853_v45, 2  ;;  %v862_v56 = vmax.f32 %v860_v36, %v861_v46  ;;  %v870_v57 = vrot.slane %v869_v47, 4  ;;  %v2189_v36 = vld [vmem:[%s2577_s29 + $0x100] sm:$0xff] }
  0x91   : > { %v847_v60 = vrot.slane %v846_v51, 1  ;;  %v1006_v61 = vsel %vm527_vm2, %v830_v50, %v1005_v52  ;;  %v627_v62 = vsel %vm177_vm0, %v2180_v48, -inf  ;;  %v635_v63 = vsel %vm177_vm0, %v2181_v49, -inf  ;;  %v2191_v48 = vld [vmem:[%s2577_s29 + $0x130] sm:$0xff]  ;;  %v2192_v49 = vld [vmem:[%s2577_s29 + $0x138] sm:$0xff] }
  0x92   : > { %v855_v1 = vmax.f32 %v853_v45, %v854_v55  ;;  %v863_v2 = vrot.slane %v862_v56, 2  ;;  %v871_v3 = vmax.f32 %v869_v47, %v870_v57  ;;  %v1007_v4 = vsel %vm529_vm3, %v839_v54, %v1006_v61 }
  0x93   : > { %v848_v7 = vmax.f32 %v846_v51, %v847_v60  ;;  %v628_v8 = vmax.f32 %v626_v53, %v627_v62  ;;  %v636_v10 = vsel %vm177_vm0, %v2182_v58, -inf  ;;  %v644_v11 = vsel %vm177_vm0, %v2183_v59, -inf  ;;  %v2193_v58 = vld [vmem:[%s2577_s29 + $0x160] sm:$0xff] }
  0x94   : > { %v856_v12 = vrot.slane %v855_v1, 1  ;;  %v864_v13 = vmax.f32 %v862_v56, %v863_v2  ;;  %v872_v14 = vrot.slane %v871_v3, 2  ;;  %v637_v17 = vmax.f32 %v635_v63, %v636_v10  ;;  %v2194_v63 = vld [vmem:[%s2577_s29 + $0x168] sm:$0xff] }
  0x95   : > { %v1008_v18 = vsel %vm531_vm4, %v848_v7, %v1007_v4  ;;  %v629_v20 = vrot.slane %v628_v8, 4  ;;  %v645_v21 = vsel %vm177_vm0, %v2184_v5, -inf  ;;  %v653_v22 = vsel %vm177_vm0, %v2185_v6, -inf }
  0x96   : > { %v857_v23 = vmax.f32 %v855_v1, %v856_v12  ;;  %v865_v24 = vrot.slane %v864_v13, 1  ;;  %v873_v25 = vmax.f32 %v871_v3, %v872_v14  ;;  %v638_v27 = vrot.slane %v637_v17, 4  ;;  %v2259_v14 = vld [vmem:[%s2577_s29 + $0x1a0] sm:$0xff] }
  0x97   : > { %v630_v28 = vmax.f32 %v628_v8, %v629_v20  ;;  %v646_v29 = vmax.f32 %v644_v11, %v645_v21  ;;  %v654_v30 = vsel %vm177_vm0, %v2186_v15, -inf  ;;  %v662_v31 = vsel %vm177_vm0, %v2187_v16, -inf  ;;  %v2260_v20 = vld [vmem:[%s2577_s29 + $0x1a8] sm:$0xff] }
  0x98   : > { %v866_v33 = vmax.f32 %v864_v13, %v865_v24  ;;  %v874_v34 = vrot.slane %v873_v25, 1  ;;  %v1009_v35 = vsel %vm533_vm5, %v857_v23, %v1008_v18  ;;  %v639_v37 = vmax.f32 %v637_v17, %v638_v27 }
  0x99   : > { %v631_v39 = vrot.slane %v630_v28, 2  ;;  %v647_v41 = vrot.slane %v646_v29, 4  ;;  %v655_v42 = vmax.f32 %v653_v22, %v654_v30  ;;  %v663_v43 = vsel %vm177_vm0, %v2188_v26, -inf }
  0x9a   : > { %v875_v44 = vmax.f32 %v873_v25, %v874_v34  ;;  %v1010_v45 = vsel %vm535_vm6, %v866_v33, %v1009_v35  ;;  %v640_v46 = vrot.slane %v639_v37, 2  ;;  %v664_v47 = vmax.f32 %v662_v31, %v663_v43  ;;  %v2262_v34 = vld [vmem:[%s2577_s29 + $0x1d8] sm:$0xff] }
  0x9b   : > { %v632_v50 = vmax.f32 %v630_v28, %v631_v39  ;;  %v648_v51 = vmax.f32 %v646_v29, %v647_v41  ;;  %v656_v52 = vrot.slane %v655_v42, 4  ;;  %v671_v53 = vsel %vm177_vm0, %v2189_v36, -inf  ;;  %v2261_v28 = vld [vmem:[%s2577_s29 + $0x1d0] sm:$0xff] }
  0x9c   : > { %v2858_v54 = vsel %vm537_vm7, %v875_v44, %v1010_v45  ;;  %v641_v55 = vmax.f32 %v639_v37, %v640_v46  ;;  %v665_v56 = vrot.slane %v664_v47, 4  ;;  %v672_v57 = vsel %vm177_vm0, %v2190_v38, -inf  ;;  %v2263_v44 = vld [vmem:[%s2577_s29 + $0x200] sm:$0xff]  ;;  %v2264_v45 = vld [vmem:[%s2577_s29 + $0x208] sm:$0xff] }
  0x9d   : > { %1033 = vrot.lane.b32.xlu0 %v2858_v54, %s2501_s30  ;;  %v633_v59 = vrot.slane %v632_v50, 1  ;;  %v649_v60 = vrot.slane %v648_v51, 2  ;;  %v657_v61 = vmax.f32 %v655_v42, %v656_v52  ;;  %v673_v62 = vmax.f32 %v671_v53, %v672_v57 }
  0x9e   : > { %v642_v1 = vrot.slane %v641_v55, 1  ;;  %v666_v2 = vmax.f32 %v664_v47, %v665_v56  ;;  %v680_v3 = vsel %vm177_vm0, %v2191_v48, -inf  ;;  %v681_v4 = vsel %vm177_vm0, %v2192_v49, -inf  ;;  %v2266_v56 = vld [vmem:[%s2577_s29 + $0x238] sm:$0xff] }
  0x9f   : > { %v634_v5 = vmax.f32 %v632_v50, %v633_v59  ;;  %v650_v6 = vmax.f32 %v648_v51, %v649_v60  ;;  %v658_v7 = vrot.slane %v657_v61, 2  ;;  %v674_v8 = vrot.slane %v673_v62, 4 }
  0xa0   : > { %v643_v10 = vmax.f32 %v641_v55, %v642_v1  ;;  %v667_v11 = vrot.slane %v666_v2, 2  ;;  %v682_v12 = vmax.f32 %v680_v3, %v681_v4  ;;  %v689_v13 = vsel %vm177_vm0, %v2193_v58, -inf  ;;  %v2265_v55 = vld [vmem:[%s2577_s29 + $0x230] sm:$0xff]  ;;  %v2267_v1 = vld [vmem:[%s2577_s29 + $0x260] sm:$0xff] }
  0xa1   : > { %v651_v15 = vrot.slane %v650_v6, 1  ;;  %v659_v16 = vmax.f32 %v657_v61, %v658_v7  ;;  %v675_v17 = vmax.f32 %v673_v62, %v674_v8  ;;  %v690_v18 = vsel %vm177_vm0, %v2194_v63, -inf }
  0xa2   : > { %v668_v21 = vmax.f32 %v666_v2, %v667_v11  ;;  %v683_v22 = vrot.slane %v682_v12, 4  ;;  %v691_v23 = vmax.f32 %v689_v13, %v690_v18  ;;  %v973_v24 = vsel %vm525_vm1, %v643_v10, %v634_v5  ;;  %v2268_v2 = vld [vmem:[%s2577_s29 + $0x268] sm:$0xff] }
  0xa3   : > { %v652_v25 = vmax.f32 %v650_v6, %v651_v15  ;;  %v660_v26 = vrot.slane %v659_v16, 1  ;;  %v676_v27 = vrot.slane %v675_v17, 2  ;;  %v1155_v29 = vsel %vm177_vm0, %v2259_v14, -inf  ;;  %v2270_v15 = vld [vmem:[%s2577_s29 + $0x298] sm:$0xff] }
  0xa4   : > { %v669_v30 = vrot.slane %v668_v21, 1  ;;  %v684_v31 = vmax.f32 %v682_v12, %v683_v22  ;;  %v692_v33 = vrot.slane %v691_v23, 4  ;;  %v1156_v35 = vsel %vm177_vm0, %v2260_v20, -inf  ;;  %v2269_v12 = vld [vmem:[%s2577_s29 + $0x290] sm:$0xff] }
  0xa5   : > { %v661_v36 = vmax.f32 %v659_v16, %v660_v26  ;;  %v677_v37 = vmax.f32 %v675_v17, %v676_v27  ;;  %v974_v38 = vsel %vm527_vm2, %v652_v25, %v973_v24  ;;  %v1157_v39 = vmax.f32 %v1155_v29, %v1156_v35  ;;  %v2271_v25 = vld [vmem:[%s2577_s29 + $0x2c0] sm:$0xff]  ;;  %v2272_v26 = vld [vmem:[%s2577_s29 + $0x2c8] sm:$0xff] }
  0xa6   : > { %v670_v41 = vmax.f32 %v668_v21, %v669_v30  ;;  %v685_v42 = vrot.slane %v684_v31, 2  ;;  %v693_v43 = vmax.f32 %v691_v23, %v692_v33  ;;  %v1164_v46 = vsel %vm177_vm0, %v2261_v28, -inf }
  0xa7   : > { %v678_v47 = vrot.slane %v677_v37, 1  ;;  %v975_v48 = vsel %vm529_vm3, %v661_v36, %v974_v38  ;;  %v1158_v49 = vrot.slane %v1157_v39, 4  ;;  %v1165_v50 = vsel %vm177_vm0, %v2262_v34, -inf  ;;  %v2273_v36 = vld [vmem:[%s2577_s29 + $0x2f0] sm:$0xff] }
  0xa8   : > { %v686_v51 = vmax.f32 %v684_v31, %v685_v42  ;;  %v694_v52 = vrot.slane %v693_v43, 2  ;;  %v976_v53 = vsel %vm531_vm4, %v670_v41, %v975_v48  ;;  %v1166_v57 = vmax.f32 %v1164_v46, %v1165_v50 }
  0xa9   : > { %v679_v58 = vmax.f32 %v677_v37, %v678_v47  ;;  %v1159_v59 = vmax.f32 %v1157_v39, %v1158_v49  ;;  %v1173_v60 = vsel %vm177_vm0, %v2263_v44, -inf  ;;  %v1174_v61 = vsel %vm177_vm0, %v2264_v45, -inf  ;;  %v2274_v37 = vld [vmem:[%s2577_s29 + $0x2f8] sm:$0xff] }
  0xaa   : > { %v687_v62 = vrot.slane %v686_v51, 1  ;;  %v695_v63 = vmax.f32 %v693_v43, %v694_v52  ;;  %v1167_v3 = vrot.slane %v1166_v57, 4  ;;  %v1175_v4 = vmax.f32 %v1173_v60, %v1174_v61  ;;  %v2196_v61 = vld [vmem:[%s2577_s29 + $0x198] sm:$0xff] }
  0xab   : > { %v977_v5 = vsel %vm533_vm5, %v679_v58, %v976_v53  ;;  %v1160_v6 = vrot.slane %v1159_v59, 2  ;;  %v1182_v7 = vsel %vm177_vm0, %v2265_v55, -inf  ;;  %v1183_v8 = vsel %vm177_vm0, %v2266_v56, -inf }
  0xac   : > { %v688_v10 = vmax.f32 %v686_v51, %v687_v62  ;;  %v696_v11 = vrot.slane %v695_v63, 1  ;;  %v1168_v13 = vmax.f32 %v1166_v57, %v1167_v3  ;;  %v1176_v14 = vrot.slane %v1175_v4, 4  ;;  %v2195_v51 = vld [vmem:[%s2577_s29 + $0x190] sm:$0xff]  ;;  %v2197_v62 = vld [vmem:[%s2577_s29 + $0x1c0] sm:$0xff] }
  0xad   : > { %v1161_v16 = vmax.f32 %v1159_v59, %v1160_v6  ;;  %v1184_v17 = vmax.f32 %v1182_v7, %v1183_v8  ;;  %v1191_v18 = vsel %vm177_vm0, %v2267_v1, -inf  ;;  %v1192_v20 = vsel %vm177_vm0, %v2268_v2, -inf  ;;  %v2198_v8 = vld [vmem:[%s2577_s29 + $0x1c8] sm:$0xff] }
  0xae   : > { %v697_v21 = vmax.f32 %v695_v63, %v696_v11  ;;  %v978_v22 = vsel %vm535_vm6, %v688_v10, %v977_v5  ;;  %v1169_v23 = vrot.slane %v1168_v13, 2  ;;  %v1177_v24 = vmax.f32 %v1175_v4, %v1176_v14  ;;  %v2199_v10 = vld [vmem:[%s2577_s29 + $0x1f0] sm:$0xff] }
  0xaf   : > { %v1162_v27 = vrot.slane %v1161_v16, 1  ;;  %v1185_v28 = vrot.slane %v1184_v17, 4  ;;  %v1193_v29 = vmax.f32 %v1191_v18, %v1192_v20  ;;  %v1200_v30 = vsel %vm177_vm0, %v2269_v12, -inf  ;;  %v2200_v20 = vld [vmem:[%s2577_s29 + $0x1f8] sm:$0xff] }
  0xb0   : > { %v2901_v31 = vsel %vm537_vm7, %v697_v21, %v978_v22  ;;  %v1170_v33 = vmax.f32 %v1168_v13, %v1169_v23  ;;  %v1178_v34 = vrot.slane %v1177_v24, 2  ;;  %v1201_v35 = vsel %vm177_vm0, %v2270_v15, -inf }
  0xb1   : > { %1029 = vrot.lane.b32.xlu2 %v2901_v31, %s2501_s30  ;;  %v1163_v38 = vmax.f32 %v1161_v16, %v1162_v27  ;;  %v1186_v39 = vmax.f32 %v1184_v17, %v1185_v28  ;;  %v1194_v41 = vrot.slane %v1193_v29, 4  ;;  %v1202_v42 = vmax.f32 %v1200_v30, %v1201_v35 }
  0xb2   : > { %v1171_v43 = vrot.slane %v1170_v33, 1  ;;  %v1179_v44 = vmax.f32 %v1177_v24, %v1178_v34  ;;  %v1209_v45 = vsel %vm177_vm0, %v2271_v25, -inf  ;;  %v1210_v46 = vsel %vm177_vm0, %v2272_v26, -inf }
  0xb3   : > { %v1187_v47 = vrot.slane %v1186_v39, 2  ;;  %v1195_v48 = vmax.f32 %v1193_v29, %v1194_v41  ;;  %v1203_v49 = vrot.slane %v1202_v42, 4  ;;  %v1211_v50 = vmax.f32 %v1209_v45, %v1210_v46  ;;  %v2201_v29 = vld [vmem:[%s2577_s29 + $0x220] sm:$0xff] }
  0xb4   : > { %v1172_v52 = vmax.f32 %v1170_v33, %v1171_v43  ;;  %v1180_v53 = vrot.slane %v1179_v44, 1  ;;  %v1218_v55 = vsel %vm177_vm0, %v2273_v36, -inf  ;;  %v1219_v56 = vsel %vm177_vm0, %v2274_v37, -inf  ;;  %v2202_v33 = vld [vmem:[%s2577_s29 + $0x228] sm:$0xff]  ;;  %v2203_v43 = vld [vmem:[%s2577_s29 + $0x250] sm:$0xff] }
  0xb5   : > { %v1188_v57 = vmax.f32 %v1186_v39, %v1187_v47  ;;  %v1196_v58 = vrot.slane %v1195_v48, 2  ;;  %v1204_v59 = vmax.f32 %v1202_v42, %v1203_v49  ;;  %v1212_v60 = vrot.slane %v1211_v50, 4 }
  0xb6   : > { %v1181_v63 = vmax.f32 %v1179_v44, %v1180_v53  ;;  %v1220_v1 = vmax.f32 %v1218_v55, %v1219_v56  ;;  %v1429_v2 = vsel %vm525_vm1, %v1172_v52, %v1163_v38  ;;  %v715_v3 = vsel %vm177_vm0, %v2195_v51, -inf  ;;  %v2204_v44 = vld [vmem:[%s2577_s29 + $0x258] sm:$0xff]  ;;  %v2205_v53 = vld [vmem:[%s2577_s29 + $0x280] sm:$0xff]  ;;  %v2206_v55 = vld [vmem:[%s2577_s29 + $0x288] sm:$0xff] }
  0xb7   : > { %v1189_v4 = vrot.slane %v1188_v57, 1  ;;  %v1197_v5 = vmax.f32 %v1195_v48, %v1196_v58  ;;  %v1205_v6 = vrot.slane %v1204_v59, 2  ;;  %v1213_v7 = vmax.f32 %v1211_v50, %v1212_v60 }
  0xb8   : > { %v1221_v11 = vrot.slane %v1220_v1, 4  ;;  %v1430_v12 = vsel %vm527_vm2, %v1181_v63, %v1429_v2  ;;  %v716_v13 = vsel %vm177_vm0, %v2196_v61, -inf  ;;  %v724_v14 = vsel %vm177_vm0, %v2197_v62, -inf }
  0xb9   : > { %v1190_v15 = vmax.f32 %v1188_v57, %v1189_v4  ;;  %v1198_v16 = vrot.slane %v1197_v5, 1  ;;  %v1206_v17 = vmax.f32 %v1204_v59, %v1205_v6  ;;  %v1214_v18 = vrot.slane %v1213_v7, 2 }
  0xba   : > { %v1222_v21 = vmax.f32 %v1220_v1, %v1221_v11  ;;  %v717_v22 = vmax.f32 %v715_v3, %v716_v13  ;;  %v725_v23 = vsel %vm177_vm0, %v2198_v8, -inf  ;;  %v733_v24 = vsel %vm177_vm0, %v2199_v10, -inf  ;;  %v2207_v1 = vld [vmem:[%s2577_s29 + $0x2b0] sm:$0xff] }
  0xbb   : > { %v1199_v25 = vmax.f32 %v1197_v5, %v1198_v16  ;;  %v1207_v26 = vrot.slane %v1206_v17, 1  ;;  %v1215_v27 = vmax.f32 %v1213_v7, %v1214_v18  ;;  %v1431_v28 = vsel %vm529_vm3, %v1190_v15, %v1430_v12  ;;  %v2208_v5 = vld [vmem:[%s2577_s29 + $0x2b8] sm:$0xff]  ;;  %v2209_v15 = vld [vmem:[%s2577_s29 + $0x2e0] sm:$0xff]  ;;  %v2210_v16 = vld [vmem:[%s2577_s29 + $0x2e8] sm:$0xff] }
  0xbc   : > { %v1223_v30 = vrot.slane %v1222_v21, 2  ;;  %v718_v34 = vrot.slane %v717_v22, 4  ;;  %v726_v35 = vmax.f32 %v724_v14, %v725_v23  ;;  %v734_v36 = vsel %vm177_vm0, %v2200_v20, -inf }
  0xbd   : > { %v1208_v37 = vmax.f32 %v1206_v17, %v1207_v26  ;;  %v1216_v38 = vrot.slane %v1215_v27, 1  ;;  %v1432_v39 = vsel %vm531_vm4, %v1199_v25, %v1431_v28  ;;  %v735_v41 = vmax.f32 %v733_v24, %v734_v36 }
  0xbe   : > { %v1224_v42 = vmax.f32 %v1222_v21, %v1223_v30  ;;  %v719_v45 = vmax.f32 %v717_v22, %v718_v34  ;;  %v727_v46 = vrot.slane %v726_v35, 4  ;;  %v742_v47 = vsel %vm177_vm0, %v2201_v29, -inf  ;;  %v2275_v30 = vld [vmem:[%s2577_s29 + $0x320] sm:$0xff] }
  0xbf   : > { %v1217_v48 = vmax.f32 %v1215_v27, %v1216_v38  ;;  %v1433_v49 = vsel %vm533_vm5, %v1208_v37, %v1432_v39  ;;  %v736_v50 = vrot.slane %v735_v41, 4  ;;  %v743_v51 = vsel %vm177_vm0, %v2202_v33, -inf }
  0xc0   : > { %v1225_v52 = vrot.slane %v1224_v42, 1  ;;  %v720_v56 = vrot.slane %v719_v45, 2  ;;  %v728_v57 = vmax.f32 %v726_v35, %v727_v46  ;;  %v744_v58 = vmax.f32 %v742_v47, %v743_v51 }
  0xc1   : > { %v1434_v59 = vsel %vm535_vm6, %v1217_v48, %v1433_v49  ;;  %v737_v60 = vmax.f32 %v735_v41, %v736_v50  ;;  %v751_v61 = vsel %vm177_vm0, %v2203_v43, -inf  ;;  %v752_v62 = vsel %vm177_vm0, %v2204_v44, -inf  ;;  %v2277_v43 = vld [vmem:[%s2577_s29 + $0x350] sm:$0xff] }
  0xc2   : > { %v1226_v63 = vmax.f32 %v1224_v42, %v1225_v52  ;;  %v721_v2 = vmax.f32 %v719_v45, %v720_v56  ;;  %v729_v3 = vrot.slane %v728_v57, 2  ;;  %v745_v4 = vrot.slane %v744_v58, 4  ;;  %v2276_v42 = vld [vmem:[%s2577_s29 + $0x328] sm:$0xff]  ;;  %v2278_v52 = vld [vmem:[%s2577_s29 + $0x358] sm:$0xff] }
  0xc3   : > { %v738_v6 = vrot.slane %v737_v60, 2  ;;  %v753_v7 = vmax.f32 %v751_v61, %v752_v62  ;;  %v760_v8 = vsel %vm177_vm0, %v2205_v53, -inf  ;;  %v761_v10 = vsel %vm177_vm0, %v2206_v55, -inf  ;;  %v2279_v53 = vld [vmem:[%s2577_s29 + $0x380] sm:$0xff]  ;;  %v2280_v62 = vld [vmem:[%s2577_s29 + $0x388] sm:$0xff] }
  0xc4   : > { %v2945_v11 = vsel %vm537_vm7, %v1226_v63, %v1434_v59  ;;  %v722_v12 = vrot.slane %v721_v2, 1  ;;  %v730_v13 = vmax.f32 %v728_v57, %v729_v3  ;;  %v746_v14 = vmax.f32 %v744_v58, %v745_v4  ;;  %v2281_v63 = vld [vmem:[%s2577_s29 + $0x3b0] sm:$0xff] }
  0xc5   : > { %1471 = vrot.lane.b32.xlu0 %v2945_v11, %s2501_s30  ;;  %v739_v17 = vmax.f32 %v737_v60, %v738_v6  ;;  %v754_v18 = vrot.slane %v753_v7, 4  ;;  %v762_v20 = vmax.f32 %v760_v8, %v761_v10  ;;  %v769_v21 = vsel %vm177_vm0, %v2207_v1, -inf  ;;  %v2282_v10 = vld [vmem:[%s2577_s29 + $0x3b8] sm:$0xff] }
  0xc6   : > { %v723_v22 = vmax.f32 %v721_v2, %v722_v12  ;;  %v731_v23 = vrot.slane %v730_v13, 1  ;;  %v747_v24 = vrot.slane %v746_v14, 2  ;;  %v770_v25 = vsel %vm177_vm0, %v2208_v5, -inf }
  0xc7   : > { %v740_v26 = vrot.slane %v739_v17, 1  ;;  %v755_v27 = vmax.f32 %v753_v7, %v754_v18  ;;  %v763_v28 = vrot.slane %v762_v20, 4  ;;  %v771_v29 = vmax.f32 %v769_v21, %v770_v25  ;;  %v2283_v21 = vld [vmem:[%s2577_s29 + $0x3e0] sm:$0xff] }
  0xc8   : > { %v732_v33 = vmax.f32 %v730_v13, %v731_v23  ;;  %v748_v34 = vmax.f32 %v746_v14, %v747_v24  ;;  %v778_v35 = vsel %vm177_vm0, %v2209_v15, -inf  ;;  %v779_v36 = vsel %vm177_vm0, %v2210_v16, -inf  ;;  %v2284_v24 = vld [vmem:[%s2577_s29 + $0x3e8] sm:$0xff] }
  0xc9   : > { %v741_v37 = vmax.f32 %v739_v17, %v740_v26  ;;  %v756_v38 = vrot.slane %v755_v27, 2  ;;  %v764_v39 = vmax.f32 %v762_v20, %v763_v28  ;;  %v772_v41 = vrot.slane %v771_v29, 4 }
  0xca   : > { %v749_v44 = vrot.slane %v748_v34, 1  ;;  %v780_v45 = vmax.f32 %v778_v35, %v779_v36  ;;  %v989_v46 = vsel %vm525_vm1, %v732_v33, %v723_v22  ;;  %v1244_v47 = vsel %vm177_vm0, %v2275_v30, -inf  ;;  %v2285_v35 = vld [vmem:[%s2577_s29 + $0x410] sm:$0xff]  ;;  %v2286_v36 = vld [vmem:[%s2577_s29 + $0x418] sm:$0xff] }
  0xcb   : > { %v757_v48 = vmax.f32 %v755_v27, %v756_v38  ;;  %v765_v49 = vrot.slane %v764_v39, 2  ;;  %v773_v50 = vmax.f32 %v771_v29, %v772_v41  ;;  %v990_v51 = vsel %vm527_vm2, %v741_v37, %v989_v46  ;;  %v2287_v46 = vld [vmem:[%s2577_s29 + $0x440] sm:$0xff] }
  0xcc   : > { %v750_v55 = vmax.f32 %v748_v34, %v749_v44  ;;  %v781_v56 = vrot.slane %v780_v45, 4  ;;  %v1245_v57 = vsel %vm177_vm0, %v2276_v42, -inf  ;;  %v1253_v58 = vsel %vm177_vm0, %v2277_v43, -inf }
  0xcd   : > { %v758_v59 = vrot.slane %v757_v48, 1  ;;  %v766_v60 = vmax.f32 %v764_v39, %v765_v49  ;;  %v774_v61 = vrot.slane %v773_v50, 2  ;;  %v1246_v1 = vmax.f32 %v1244_v47, %v1245_v57  ;;  %v2289_v57 = vld [vmem:[%s2577_s29 + $0x470] sm:$0xff] }
  0xce   : > { %v782_v2 = vmax.f32 %v780_v45, %v781_v56  ;;  %v991_v3 = vsel %vm529_vm3, %v750_v55, %v990_v51  ;;  %v1254_v4 = vsel %vm177_vm0, %v2278_v52, -inf  ;;  %v1262_v5 = vsel %vm177_vm0, %v2279_v53, -inf }
  0xcf   : > { %v759_v6 = vmax.f32 %v757_v48, %v758_v59  ;;  %v767_v7 = vrot.slane %v766_v60, 1  ;;  %v775_v8 = vmax.f32 %v773_v50, %v774_v61  ;;  %v1247_v12 = vrot.slane %v1246_v1, 4  ;;  %v2288_v50 = vld [vmem:[%s2577_s29 + $0x448] sm:$0xff]  ;;  %v2290_v61 = vld [vmem:[%s2577_s29 + $0x478] sm:$0xff] }
  0xd0   : > { %v783_v13 = vrot.slane %v782_v2, 2  ;;  %v1255_v14 = vmax.f32 %v1253_v58, %v1254_v4  ;;  %v1263_v15 = vsel %vm177_vm0, %v2280_v62, -inf  ;;  %v1271_v16 = vsel %vm177_vm0, %v2281_v63, -inf }
  0xd1   : > { %v768_v17 = vmax.f32 %v766_v60, %v767_v7  ;;  %v776_v18 = vrot.slane %v775_v8, 1  ;;  %v992_v20 = vsel %vm531_vm4, %v759_v6, %v991_v3  ;;  %v1248_v22 = vmax.f32 %v1246_v1, %v1247_v12 }
  0xd2   : > { %v784_v23 = vmax.f32 %v782_v2, %v783_v13  ;;  %v1256_v25 = vrot.slane %v1255_v14, 4  ;;  %v1264_v26 = vmax.f32 %v1262_v5, %v1263_v15  ;;  %v1272_v27 = vsel %vm177_vm0, %v2282_v10, -inf  ;;  %v2243_v13 = vld [vmem:[%s2577_s29 + $0x20] sm:$0xff] }
  0xd3   : > { %v777_v28 = vmax.f32 %v775_v8, %v776_v18  ;;  %v993_v29 = vsel %vm533_vm5, %v768_v17, %v992_v20  ;;  %v1249_v30 = vrot.slane %v1248_v22, 2  ;;  %v1273_v33 = vmax.f32 %v1271_v16, %v1272_v27 }
  0xd4   : > { %v785_v34 = vrot.slane %v784_v23, 1  ;;  %v1257_v37 = vmax.f32 %v1255_v14, %v1256_v25  ;;  %v1265_v38 = vrot.slane %v1264_v26, 4  ;;  %v1280_v39 = vsel %vm177_vm0, %v2283_v21, -inf }
  0xd5   : > { %v994_v41 = vsel %vm535_vm6, %v777_v28, %v993_v29  ;;  %v1250_v42 = vmax.f32 %v1248_v22, %v1249_v30  ;;  %v1274_v43 = vrot.slane %v1273_v33, 4  ;;  %v1281_v44 = vsel %vm177_vm0, %v2284_v24, -inf  ;;  %v2245_v24 = vld [vmem:[%s2577_s29 + $0x50] sm:$0xff] }
  0xd6   : > { %v786_v45 = vmax.f32 %v784_v23, %v785_v34  ;;  %v1258_v47 = vrot.slane %v1257_v37, 2  ;;  %v1266_v48 = vmax.f32 %v1264_v26, %v1265_v38  ;;  %v1282_v49 = vmax.f32 %v1280_v39, %v1281_v44  ;;  %v2244_v23 = vld [vmem:[%s2577_s29 + $0x28] sm:$0xff] }
  0xd7   : > { %v1251_v51 = vrot.slane %v1250_v42, 1  ;;  %v1275_v52 = vmax.f32 %v1273_v33, %v1274_v43  ;;  %v1289_v53 = vsel %vm177_vm0, %v2285_v35, -inf  ;;  %v1290_v55 = vsel %vm177_vm0, %v2286_v36, -inf  ;;  %v2246_v35 = vld [vmem:[%s2577_s29 + $0x58] sm:$0xff]  ;;  %v2247_v36 = vld [vmem:[%s2577_s29 + $0x80] sm:$0xff] }
  0xd8   : > { %v2988_v56 = vsel %vm537_vm7, %v786_v45, %v994_v41  ;;  %v1259_v58 = vmax.f32 %v1257_v37, %v1258_v47  ;;  %v1267_v59 = vrot.slane %v1266_v48, 2  ;;  %v1283_v60 = vrot.slane %v1282_v49, 4  ;;  %v2249_v47 = vld [vmem:[%s2577_s29 + $0xb0] sm:$0xff] }
  0xd9   : > { %1031 = vrot.lane.b32.xlu2 %v2988_v56, %s2501_s30  ;;  %v1252_v62 = vmax.f32 %v1250_v42, %v1251_v51  ;;  %v1276_v63 = vrot.slane %v1275_v52, 2  ;;  %v1291_v1 = vmax.f32 %v1289_v53, %v1290_v55  ;;  %v1298_v2 = vsel %vm177_vm0, %v2287_v46, -inf  ;;  %v2248_v46 = vld [vmem:[%s2577_s29 + $0x88] sm:$0xff] }
  0xda   : > { %v1260_v3 = vrot.slane %v1259_v58, 1  ;;  %v1268_v4 = vmax.f32 %v1266_v48, %v1267_v59  ;;  %v1284_v5 = vmax.f32 %v1282_v49, %v1283_v60  ;;  %v1299_v6 = vsel %vm177_vm0, %v2288_v50, -inf }
  0xdb   : > { %v1277_v7 = vmax.f32 %v1275_v52, %v1276_v63  ;;  %v1292_v8 = vrot.slane %v1291_v1, 4  ;;  %v1300_v10 = vmax.f32 %v1298_v2, %v1299_v6  ;;  %v1307_v12 = vsel %vm177_vm0, %v2289_v57, -inf  ;;  %v2250_v57 = vld [vmem:[%s2577_s29 + $0xb8] sm:$0xff] }
  0xdc   : > { %v1261_v14 = vmax.f32 %v1259_v58, %v1260_v3  ;;  %v1269_v15 = vrot.slane %v1268_v4, 1  ;;  %v1285_v16 = vrot.slane %v1284_v5, 2  ;;  %v1308_v17 = vsel %vm177_vm0, %v2290_v61, -inf  ;;  %v2251_v58 = vld [vmem:[%s2577_s29 + $0xe0] sm:$0xff] }
  0xdd   : > { %v1278_v18 = vrot.slane %v1277_v7, 1  ;;  %v1293_v20 = vmax.f32 %v1291_v1, %v1292_v8  ;;  %v1301_v21 = vrot.slane %v1300_v10, 4  ;;  %v1309_v22 = vmax.f32 %v1307_v12, %v1308_v17  ;;  %v2254_v17 = vld [vmem:[%s2577_s29 + $0x118] sm:$0xff] }
  0xde   : > { %v1270_v25 = vmax.f32 %v1268_v4, %v1269_v15  ;;  %v1286_v26 = vmax.f32 %v1284_v5, %v1285_v16  ;;  %v1445_v27 = vsel %vm525_vm1, %v1261_v14, %v1252_v62  ;;  %v1066_v28 = vsel %vm177_vm0, %v2243_v13, -inf  ;;  %v2252_v4 = vld [vmem:[%s2577_s29 + $0xe8] sm:$0xff]  ;;  %v2253_v15 = vld [vmem:[%s2577_s29 + $0x110] sm:$0xff] }
  0xdf   : > { %v1279_v29 = vmax.f32 %v1277_v7, %v1278_v18  ;;  %v1294_v30 = vrot.slane %v1293_v20, 2  ;;  %v1302_v33 = vmax.f32 %v1300_v10, %v1301_v21  ;;  %v1310_v34 = vrot.slane %v1309_v22, 4 }
  0xe0   : > { %v1287_v37 = vrot.slane %v1286_v26, 1  ;;  %v1446_v38 = vsel %vm527_vm2, %v1270_v25, %v1445_v27  ;;  %v1067_v39 = vsel %vm177_vm0, %v2244_v23, -inf  ;;  %v1075_v41 = vsel %vm177_vm0, %v2245_v24, -inf  ;;  %v2255_v27 = vld [vmem:[%s2577_s29 + $0x140] sm:$0xff] }
  0xe1   : > { %v1295_v42 = vmax.f32 %v1293_v20, %v1294_v30  ;;  %v1303_v43 = vrot.slane %v1302_v33, 2  ;;  %v1311_v44 = vmax.f32 %v1309_v22, %v1310_v34  ;;  %v1447_v45 = vsel %vm529_vm3, %v1279_v29, %v1446_v38 }
  0xe2   : > { %v1288_v48 = vmax.f32 %v1286_v26, %v1287_v37  ;;  %v1068_v49 = vmax.f32 %v1066_v28, %v1067_v39  ;;  %v1076_v50 = vsel %vm177_vm0, %v2246_v35, -inf  ;;  %v1084_v51 = vsel %vm177_vm0, %v2247_v36, -inf  ;;  %v2256_v28 = vld [vmem:[%s2577_s29 + $0x148] sm:$0xff]  ;;  %v2257_v39 = vld [vmem:[%s2577_s29 + $0x170] sm:$0xff] }
  0xe3   : > { %v1296_v52 = vrot.slane %v1295_v42, 1  ;;  %v1304_v53 = vmax.f32 %v1302_v33, %v1303_v43  ;;  %v1312_v55 = vrot.slane %v1311_v44, 2  ;;  %v1077_v59 = vmax.f32 %v1075_v41, %v1076_v50 }
  0xe4   : > { %v1448_v60 = vsel %vm531_vm4, %v1288_v48, %v1447_v45  ;;  %v1069_v61 = vrot.slane %v1068_v49, 4  ;;  %v1085_v62 = vsel %vm177_vm0, %v2248_v46, -inf  ;;  %v1093_v63 = vsel %vm177_vm0, %v2249_v47, -inf  ;;  %v2258_v45 = vld [vmem:[%s2577_s29 + $0x178] sm:$0xff] }
  0xe5   : > { %v1297_v1 = vmax.f32 %v1295_v42, %v1296_v52  ;;  %v1305_v2 = vrot.slane %v1304_v53, 1  ;;  %v1313_v3 = vmax.f32 %v1311_v44, %v1312_v55  ;;  %v1078_v5 = vrot.slane %v1077_v59, 4 }
  0xe6   : > { %v1070_v6 = vmax.f32 %v1068_v49, %v1069_v61  ;;  %v1086_v7 = vmax.f32 %v1084_v51, %v1085_v62  ;;  %v1094_v8 = vsel %vm177_vm0, %v2250_v57, -inf  ;;  %v1102_v10 = vsel %vm177_vm0, %v2251_v58, -inf }
  0xe7   : > { %v1306_v12 = vmax.f32 %v1304_v53, %v1305_v2  ;;  %v1314_v13 = vrot.slane %v1313_v3, 1  ;;  %v1449_v14 = vsel %vm533_vm5, %v1297_v1, %v1448_v60  ;;  %v1079_v16 = vmax.f32 %v1077_v59, %v1078_v5  ;;  %v2291_v60 = vld [vmem:[%s2577_s29 + $0x4a0] sm:$0xff]  ;;  %v2292_v2 = vld [vmem:[%s2577_s29 + $0x4a8] sm:$0xff] }
  0xe8   : > { %v1071_v18 = vrot.slane %v1070_v6, 2  ;;  %v1087_v20 = vrot.slane %v1086_v7, 4  ;;  %v1095_v21 = vmax.f32 %v1093_v63, %v1094_v8  ;;  %v1103_v22 = vsel %vm177_vm0, %v2252_v4, -inf }
  0xe9   : > { %v1315_v23 = vmax.f32 %v1313_v3, %v1314_v13  ;;  %v1450_v24 = vsel %vm535_vm6, %v1306_v12, %v1449_v14  ;;  %v1080_v25 = vrot.slane %v1079_v16, 2  ;;  %v1104_v26 = vmax.f32 %v1102_v10, %v1103_v22  ;;  %v2293_v12 = vld [vmem:[%s2577_s29 + $0x4d0] sm:$0xff] }
  0xea   : > { %v1072_v29 = vmax.f32 %v1070_v6, %v1071_v18  ;;  %v1088_v30 = vmax.f32 %v1086_v7, %v1087_v20  ;;  %v1096_v33 = vrot.slane %v1095_v21, 4  ;;  %v1111_v34 = vsel %vm177_vm0, %v2253_v15, -inf }
  0xeb   : > { %v3030_v35 = vsel %vm537_vm7, %v1315_v23, %v1450_v24  ;;  %v1081_v36 = vmax.f32 %v1079_v16, %v1080_v25  ;;  %v1105_v37 = vrot.slane %v1104_v26, 4  ;;  %v1112_v38 = vsel %vm177_vm0, %v2254_v17, -inf  ;;  %v2294_v17 = vld [vmem:[%s2577_s29 + $0x4d8] sm:$0xff] }
  0xec   : > { %1473 = vrot.lane.b32.xlu1 %v3030_v35, %s2501_s30  ;;  %v1073_v41 = vrot.slane %v1072_v29, 1  ;;  %v1089_v42 = vrot.slane %v1088_v30, 2  ;;  %v1097_v43 = vmax.f32 %v1095_v21, %v1096_v33  ;;  %v1113_v44 = vmax.f32 %v1111_v34, %v1112_v38 }
  0xed   : > { %v1082_v46 = vrot.slane %v1081_v36, 1  ;;  %v1106_v47 = vmax.f32 %v1104_v26, %v1105_v37  ;;  %v1120_v48 = vsel %vm177_vm0, %v2255_v27, -inf  ;;  %v1121_v49 = vsel %vm177_vm0, %v2256_v28, -inf  ;;  %v2295_v27 = vld [vmem:[%s2577_s29 + $0x500] sm:$0xff]  ;;  %v2296_v28 = vld [vmem:[%s2577_s29 + $0x508] sm:$0xff] }
  0xee   : > { %v1074_v50 = vmax.f32 %v1072_v29, %v1073_v41  ;;  %v1090_v51 = vmax.f32 %v1088_v30, %v1089_v42  ;;  %v1098_v52 = vrot.slane %v1097_v43, 2  ;;  %v1114_v53 = vrot.slane %v1113_v44, 4  ;;  %v2297_v41 = vld [vmem:[%s2577_s29 + $0x530] sm:$0xff]  ;;  %v2298_v42 = vld [vmem:[%s2577_s29 + $0x538] sm:$0xff] }
  0xef   : > { %v1083_v55 = vmax.f32 %v1081_v36, %v1082_v46  ;;  %v1107_v57 = vrot.slane %v1106_v47, 2  ;;  %v1122_v58 = vmax.f32 %v1120_v48, %v1121_v49  ;;  %v1129_v59 = vsel %vm177_vm0, %v2257_v39, -inf }
  0xf0   : > { %v1091_v61 = vrot.slane %v1090_v51, 1  ;;  %v1099_v62 = vmax.f32 %v1097_v43, %v1098_v52  ;;  %v1115_v63 = vmax.f32 %v1113_v44, %v1114_v53  ;;  %v1130_v1 = vsel %vm177_vm0, %v2258_v45, -inf }
  0xf1   : > { %v1108_v3 = vmax.f32 %v1106_v47, %v1107_v57  ;;  %v1123_v4 = vrot.slane %v1122_v58, 4  ;;  %v1131_v5 = vmax.f32 %v1129_v59, %v1130_v1  ;;  %v1413_v6 = vsel %vm525_vm1, %v1083_v55, %v1074_v50  ;;  %v2299_v50 = vld [vmem:[%s2577_s29 + $0x560] sm:$0xff] }
  0xf2   : > { %v1092_v7 = vmax.f32 %v1090_v51, %v1091_v61  ;;  %v1100_v8 = vrot.slane %v1099_v62, 1  ;;  %v1116_v10 = vrot.slane %v1115_v63, 2  ;;  %v1333_v13 = vsel %vm177_vm0, %v2291_v60, -inf  ;;  %v2300_v51 = vld [vmem:[%s2577_s29 + $0x568] sm:$0xff] }
  0xf3   : > { %v1109_v14 = vrot.slane %v1108_v3, 1  ;;  %v1124_v15 = vmax.f32 %v1122_v58, %v1123_v4  ;;  %v1132_v16 = vrot.slane %v1131_v5, 4  ;;  %v1334_v18 = vsel %vm177_vm0, %v2292_v2, -inf  ;;  %v2302_v2 = vld [vmem:[%s2577_s29 + $0x598] sm:$0xff] }
  0xf4   : > { %v1101_v20 = vmax.f32 %v1099_v62, %v1100_v8  ;;  %v1117_v21 = vmax.f32 %v1115_v63, %v1116_v10  ;;  %v1414_v22 = vsel %vm527_vm2, %v1092_v7, %v1413_v6  ;;  %v1335_v23 = vmax.f32 %v1333_v13, %v1334_v18  ;;  %v2301_v62 = vld [vmem:[%s2577_s29 + $0x590] sm:$0xff]  ;;  %v2303_v13 = vld [vmem:[%s2577_s29 + $0x5c0] sm:$0xff] }
  0xf5   : > { %v1110_v24 = vmax.f32 %v1108_v3, %v1109_v14  ;;  %v1125_v25 = vrot.slane %v1124_v15, 2  ;;  %v1133_v26 = vmax.f32 %v1131_v5, %v1132_v16  ;;  %v1342_v29 = vsel %vm177_vm0, %v2293_v12, -inf  ;;  %v2304_v14 = vld [vmem:[%s2577_s29 + $0x5c8] sm:$0xff] }
  0xf6   : > { %v1118_v30 = vrot.slane %v1117_v21, 1  ;;  %v1415_v33 = vsel %vm529_vm3, %v1101_v20, %v1414_v22  ;;  %v1336_v34 = vrot.slane %v1335_v23, 4  ;;  %v1343_v36 = vsel %vm177_vm0, %v2294_v17, -inf  ;;  %v3072_v20 = vpop.permute.xlu1 %592 }
  0xf7   : > { %v1126_v37 = vmax.f32 %v1124_v15, %v1125_v25  ;;  %v1134_v38 = vrot.slane %v1133_v26, 2  ;;  %v1416_v39 = vsel %vm531_vm4, %v1110_v24, %v1415_v33  ;;  %v1344_v43 = vmax.f32 %v1342_v29, %v1343_v36 }
  0xf8   : > { %v1119_v44 = vmax.f32 %v1117_v21, %v1118_v30  ;;  %v1337_v45 = vmax.f32 %v1335_v23, %v1336_v34  ;;  %v1351_v46 = vsel %vm177_vm0, %v2295_v27, -inf  ;;  %v1352_v47 = vsel %vm177_vm0, %v2296_v28, -inf  ;;  %v589_v21 = vpop.permute.xlu0 %588  ;;  %v2306_v27 = vld [vmem:[%s2577_s29 + $0x5f8] sm:$0xff] }
  0xf9   : > { %v1127_v48 = vrot.slane %v1126_v37, 1  ;;  %v1135_v49 = vmax.f32 %v1133_v26, %v1134_v38  ;;  %v1345_v52 = vrot.slane %v1344_v43, 4  ;;  %v1353_v53 = vmax.f32 %v1351_v46, %v1352_v47  ;;  %v2305_v26 = vld [vmem:[%s2577_s29 + $0x5f0] sm:$0xff]  ;;  %s3358_s29 = sld [smem:[#allocation2 + $0x5]] }
  0xfa   : > { %v1417_v55 = vsel %vm533_vm5, %v1119_v44, %v1416_v39  ;;  %v1338_v57 = vrot.slane %v1337_v45, 2  ;;  %v1360_v58 = vsel %vm177_vm0, %v2297_v41, -inf  ;;  %v1361_v59 = vsel %vm177_vm0, %v2298_v42, -inf }
  0xfb   : > { %v1128_v60 = vmax.f32 %v1126_v37, %v1127_v48  ;;  %v1136_v61 = vrot.slane %v1135_v49, 1  ;;  %v1346_v63 = vmax.f32 %v1344_v43, %v1345_v52  ;;  %v1354_v1 = vrot.slane %v1353_v53, 4 }
  0xfc   : > { %v1339_v3 = vmax.f32 %v1337_v45, %v1338_v57  ;;  %v1362_v4 = vmax.f32 %v1360_v58, %v1361_v59  ;;  %v1369_v5 = vsel %vm177_vm0, %v2299_v50, -inf  ;;  %v1370_v6 = vsel %vm177_vm0, %v2300_v51, -inf }
  0xfd   : > { %v1137_v7 = vmax.f32 %v1135_v49, %v1136_v61  ;;  %v1418_v8 = vsel %vm535_vm6, %v1128_v60, %v1417_v55  ;;  %v1347_v10 = vrot.slane %v1346_v63, 2  ;;  %v1355_v12 = vmax.f32 %v1353_v53, %v1354_v1 }
  0xfe   : > { %v1340_v15 = vrot.slane %v1339_v3, 1  ;;  %v1363_v16 = vrot.slane %v1362_v4, 4  ;;  %v1371_v17 = vmax.f32 %v1369_v5, %v1370_v6  ;;  %v1378_v18 = vsel %vm177_vm0, %v2301_v62, -inf  ;;  %v595_v5 = vpop.permute.xlu1 %594 }
  0xff   : > { %v3075_v22 = vsel %vm537_vm7, %v1137_v7, %v1418_v8  ;;  %v1348_v23 = vmax.f32 %v1346_v63, %v1347_v10  ;;  %v1356_v24 = vrot.slane %v1355_v12, 2  ;;  %v1379_v25 = vsel %vm177_vm0, %v2302_v2, -inf }
 0x100   : > { %1469 = vrot.lane.b32.xlu2 %v3075_v22, %s2501_s30  ;;  %v1341_v28 = vmax.f32 %v1339_v3, %v1340_v15  ;;  %v1364_v29 = vmax.f32 %v1362_v4, %v1363_v16  ;;  %v1372_v30 = vrot.slane %v1371_v17, 4  ;;  %v1380_v33 = vmax.f32 %v1378_v18, %v1379_v25  ;;  %v591_v6 = vpop.permute.xlu0 %590 }
 0x101   : > { %v1349_v34 = vrot.slane %v1348_v23, 1  ;;  %v1357_v36 = vmax.f32 %v1355_v12, %v1356_v24  ;;  %v1387_v37 = vsel %vm177_vm0, %v2303_v13, -inf  ;;  %v1388_v38 = vsel %vm177_vm0, %v2304_v14, -inf }
 0x102   : > { %v1365_v39 = vrot.slane %v1364_v29, 2  ;;  %v1373_v41 = vmax.f32 %v1371_v17, %v1372_v30  ;;  %v1381_v42 = vrot.slane %v1380_v33, 4  ;;  %v1389_v43 = vmax.f32 %v1387_v37, %v1388_v38 }
 0x103   : > { %v1350_v44 = vmax.f32 %v1348_v23, %v1349_v34  ;;  %v1358_v45 = vrot.slane %v1357_v36, 1  ;;  %v1396_v46 = vsel %vm177_vm0, %v2305_v26, -inf  ;;  %v1397_v47 = vsel %vm177_vm0, %v2306_v27, -inf }
 0x104   : > { %v1366_v48 = vmax.f32 %v1364_v29, %v1365_v39  ;;  %v1374_v49 = vrot.slane %v1373_v41, 2  ;;  %v1382_v50 = vmax.f32 %v1380_v33, %v1381_v42  ;;  %v1390_v51 = vrot.slane %v1389_v43, 4 }
 0x105   : > { %v1359_v52 = vmax.f32 %v1357_v36, %v1358_v45  ;;  %v1398_v53 = vmax.f32 %v1396_v46, %v1397_v47  ;;  %v1461_v55 = vsel %vm525_vm1, %v1350_v44, %v1341_v28  ;;  %v601_v63 = vsel %vm600_vm8, %v589_v21, -inf }
 0x106   : > { %v1367_v57 = vrot.slane %v1366_v48, 1  ;;  %v1375_v58 = vmax.f32 %v1373_v41, %v1374_v49  ;;  %v1383_v59 = vrot.slane %v1382_v50, 2  ;;  %v1391_v60 = vmax.f32 %v1389_v43, %v1390_v51  ;;  %v1036_v39 = vpop.permute.xlu1 %1035 }
 0x107   : > { %v1399_v61 = vrot.slane %v1398_v53, 4  ;;  %v1462_v62 = vsel %vm527_vm2, %v1359_v52, %v1461_v55  ;;  %v3090_v8 = vmax.f32 %v2683_v32, %v601_v63  ;;  %v604_v16 = vsel %vm600_vm8, %v595_v5, -inf }
 0x108   : > { %v1368_v1 = vmax.f32 %v1366_v48, %v1367_v57  ;;  %v1376_v2 = vrot.slane %v1375_v58, 1  ;;  %v1384_v3 = vmax.f32 %v1382_v50, %v1383_v59  ;;  %v1392_v4 = vrot.slane %v1391_v60, 2 }
 0x109   : > { %v1400_v7 = vmax.f32 %v1398_v53, %v1399_v61  ;;  %1493 = vrot.lane.b32.xlu0 %v3090_v8, %s2502_s3  ;;  %v602_v17 = vsel %vm600_vm8, %v591_v6, -inf  ;;  %v3105_v28 = vmax.f32 %v2729_v9, %v604_v16  ;;  %v1044_v41 = vsel %vm600_vm8, %v1036_v39, -inf }
 0x10a   : > { %v1377_v10 = vmax.f32 %v1375_v58, %v1376_v2  ;;  %v1385_v12 = vrot.slane %v1384_v3, 1  ;;  %v1393_v13 = vmax.f32 %v1391_v60, %v1392_v4  ;;  %v1463_v14 = vsel %vm529_vm3, %v1368_v1, %v1462_v62 }
 0x10b   : > { %v1401_v15 = vrot.slane %v1400_v7, 2  ;;  %v3099_v32 = vmax.f32 %v2770_v40, %v602_v17  ;;  %v603_v40 = vsel %vm600_vm8, %v3072_v20, -inf  ;;  %v1030_v20 = vpop.permute.xlu2 %1029  ;;  %v1610_v58 = vstv %s2307_s5  ;;  %s2322_s5 = sld [smem:[#allocation2 + $0xf]] }
 0x10c   : > { %v1386_v18 = vmax.f32 %v1384_v3, %v1385_v12  ;;  %v1394_v21 = vrot.slane %v1393_v13, 1  ;;  %v1464_v23 = vsel %vm531_vm4, %v1377_v10, %v1463_v14  ;;  %v3117_v9 = vmax.f32 %v2642_v0, %v603_v40 }
 0x10d   : > { %v1402_v24 = vmax.f32 %v1400_v7, %v1401_v15  ;;  %1495 = vrot.lane.b32.xlu1 %v3099_v32, %s2502_s3  ;;  %v1041_v0 = vsel %vm600_vm8, %v1030_v20, -inf  ;;  %v1710_v59 = vstv %s2317_s6  ;;  %v3196_v60 = vstv %s2327_s7  ;;  %s2332_s6 = sld [smem:[#allocation2 + $0x18]] }
 0x10e   : > { %v1395_v25 = vmax.f32 %v1393_v13, %v1394_v21  ;;  %v1465_v26 = vsel %vm533_vm5, %v1386_v18, %v1464_v23  ;;  %v3135_v38 = vmax.f32 %v2901_v31, %v1041_v0  ;;  %v1611_v62 = vmul.f32 %v1610_v58, %v3090_v8  ;;  %s2313_s7 = sld [smem:[#allocation2 + $0x7]] }
 0x10f   : > { %v1403_v27 = vrot.slane %v1402_v24, 1  ;;  %v1034_v34 = vpop.permute.xlu0 %1033  ;;  %v1711_v63 = vmul.f32 %v1710_v59, %v3090_v8  ;;  %v1811_v1 = vmul.f32 %v3196_v60, %v3090_v8  ;;  %v1613_v2 = vmul.f32 %v1610_v58, %v3117_v9 }
 0x110   : > { %v1466_v29 = vsel %vm535_vm6, %v1395_v25, %v1465_v26  ;;  %v1043_v36 = vsel %vm600_vm8, %v1034_v34, -inf  ;;  %v3215_v3 = vstv %s2310_s8  ;;  %v3217_v4 = vstv %s2320_s14  ;;  %s2323_s8 = sld [smem:[#allocation2 + $0x10]] }
 0x111   : > { %v1404_v30 = vmax.f32 %v1402_v24, %v1403_v27  ;;  %1499 = vrot.lane.b32.xlu0 %v3105_v28, %s2502_s3  ;;  %v3127_v37 = vmax.f32 %v2858_v54, %v1043_v36  ;;  %v3141_v54 = vmax.f32 %v2816_v19, %v1044_v41  ;;  %3746 = vst [vmem:[#allocation13_spill] sm:$0xff] %v3217_v4  ;;  %v3240_v14 = vstv %s2330_s16  ;;  %s2333_s14 = sld [smem:[#allocation2 + $0x19]] }
 0x112   : > { %v1713_v5 = vmul.f32 %v1710_v59, %v3117_v9  ;;  %v1813_v6 = vmul.f32 %v3196_v60, %v3117_v9  ;;  %v3225_v7 = vmul.f32 %v1610_v58, %v3099_v32  ;;  %v3231_v10 = vmul.f32 %v1610_v58, %v3105_v28  ;;  %s3413_s16 = sld [smem:[#allocation2 + $0x8]] }
 0x113   : > { %v1467_v33 = vsel %vm537_vm7, %v1404_v30, %v1466_v29  ;;  %3741 = vst [vmem:[#allocation8_spill] sm:$0xff] %v3141_v54  ;;  %v3234_v12 = vmul.f32 %v1710_v59, %v3105_v28  ;;  %v3238_v13 = vmul.f32 %v3196_v60, %v3105_v28  ;;  %v3242_v15 = vstv %s1599_s17  ;;  %s3418_s17 = sld [smem:[#allocation2 + $0x11]] }
 0x114   : > { %1475 = vrot.lane.b32.xlu2 %v1467_v33, %s2501_s30  ;;  %v3247_v18 = vmul.f32 %v3215_v3, %v3135_v38  ;;  %v3251_v21 = vmul.f32 %v3217_v4, %v3135_v38  ;;  %v3256_v25 = vmul.f32 %v3215_v3, %v3127_v37  ;;  %v3260_v26 = vmul.f32 %v3217_v4, %v3127_v37  ;;  %s3361_s30 = sld [smem:[#allocation2 + $0xe]] }
 0x115   : > { %1550 = vrot.lane.b32.xlu1 %v3090_v8, %s2503_s4  ;;  %v3228_v8 = vmul.f32 %v1710_v59, %v3099_v32  ;;  %v3264_v27 = vmul.f32 %v3240_v14, %v3127_v37  ;;  %v3270_v29 = vstv %s3194_s22  ;;  %v3273_v30 = vstv %s3198_s23  ;;  %s3428_s22 = sld [smem:[#allocation2 + $0x1b]] }
 0x116   : > { %v3277_v40 = vstv %s3200_s24  ;;  %s3430_s23 = sld [smem:[#allocation2 + $0x1c]] }
 0x117   : > { %s3432_s24 = sld [smem:[#allocation2 + $0x1d]] }
 0x119   : > { %1554 = vrot.lane.b32.xlu0 %v3117_v9, %s2503_s4 }
 0x11c   : > { %1497 = vrot.lane.b32.xlu2 %v3117_v9, %s2502_s3  ;;  %v3280_v9 = vstv %s3202_s25  ;;  %s3434_s25 = sld [smem:[#allocation2 + $0x1e]] }
 0x11d   : > { %1556 = vrot.lane.b32.xlu1 %v3105_v28, %s2503_s4  ;;  %v3267_v28 = vstv %s3192_s21  ;;  %s3420_s21 = sld [smem:[#allocation2 + $0x1a]] }
 0x124   : > { %1552 = vrot.lane.b32.xlu2 %v3099_v32, %s2503_s4 }
 0x125   : > { %1518 = vrot.lane.b32.xlu1 %v3127_v37, %s2502_s3 }
 0x12c   : > { %1514 = vrot.lane.b32.xlu2 %v3135_v38, %s2502_s3 }
 0x133   : > { %v1032_v42 = vpop.permute.xlu2 %1031 }
 0x134   : > { %v1042_v43 = vsel %vm600_vm8, %v1032_v42, -inf  ;;  %1520 = vrot.lane.b32.xlu2 %v3141_v54, %s2502_s3  ;;  %v3290_v42 = vstv %s3206_s26  ;;  %s3436_s26 = sld [smem:[#allocation2 + $0x1f]] }
 0x135   : > { %v3147_v44 = vmax.f32 %v2988_v56, %v1042_v43  ;;  %v3293_v43 = vstv %s3213_s27  ;;  %s3438_s27 = sld [smem:[#allocation2 + $0x20]] }
 0x137   : > { %1516 = vrot.lane.b32.xlu0 %v3147_v44, %s2502_s3  ;;  %1569 = vrot.lane.b32.xlu1 %v3147_v44, %s2503_s4  ;;  %v1472_v31 = vpop.permute.xlu0 %1471 }
 0x138   : > { %v1482_v19 = vsel %vm600_vm8, %v1472_v31, -inf  ;;  %v3296_v31 = vstv %s3222_s28  ;;  %s3440_s28 = sld [smem:[#allocation2 + $0x27]] }
 0x139   : > { %v3159_v45 = vmax.f32 %v2945_v11, %v1482_v19 }
 0x13b   : > { %3742 = vst [vmem:[#allocation9_spill] sm:$0xff] %v3159_v45 }
 0x13c   : > { %1571 = vrot.lane.b32.xlu2 %v3127_v37, %s2503_s4 }
 0x13f   : > { %1567 = vrot.lane.b32.xlu0 %v3135_v38, %s2503_s4 }
 0x144   : > { %1536 = vrot.lane.b32.xlu2 %v3159_v45, %s2502_s3 }
 0x147   : > { %1573 = vrot.lane.b32.xlu0 %v3141_v54, %s2503_s4 }
 0x15a   : > { %v1470_v56 = vpop.permute.xlu2 %1469 }
 0x15b   : > { %v1481_v46 = vsel %vm600_vm8, %v1470_v56, -inf }
 0x15c   : > { %v3167_v47 = vmax.f32 %v3075_v22, %v1481_v46 }
 0x15e   : > { %3743 = vst [vmem:[#allocation10_spill] sm:$0xff] %v3167_v47  ;;  %v1474_v48 = vpop.permute.xlu1 %1473  ;;  %1534 = vrot.lane.b32.xlu1 %v3167_v47, %s2502_s3  ;;  %1583 = vrot.lane.b32.xlu2 %v3167_v47, %s2503_s4 }
 0x15f   : > { %v1483_v11 = vsel %vm600_vm8, %v1474_v48, -inf }
 0x160   : > { %v3175_v49 = vmax.f32 %v3030_v35, %v1483_v11 }
 0x162   : > { %3744 = vst [vmem:[#allocation11_spill] sm:$0xff] %v3175_v49  ;;  %1538 = vrot.lane.b32.xlu0 %v3175_v49, %s2502_s3 }
 0x16a   : > { %1585 = vrot.lane.b32.xlu0 %v3159_v45, %s2503_s4 }
 0x16e   : > { %v1476_v22 = vpop.permute.xlu2 %1475 }
 0x16f   : > { %v1484_v50 = vsel %vm600_vm8, %v1476_v22, -inf }
 0x170   : > { %v3182_v51 = vmax.f32 %v1467_v33, %v1484_v50 }
 0x172   : > { %3745 = vst [vmem:[#allocation12_spill] sm:$0xff] %v3182_v51  ;;  %1540 = vrot.lane.b32.xlu1 %v3182_v51, %s2502_s3  ;;  %1589 = vrot.lane.b32.xlu2 %v3182_v51, %s2503_s4  ;;  %s3364_s3 = sld [smem:[#allocation2 + $0x17]] }
 0x176   : > { %v1498_v53 = vpop.permute.xlu2 %1497 }
 0x177   : > { %v1508_v16 = vsel %vm1505_vm9, 0.0, %v1498_v53 }
 0x178   : > { %v1603_v33 = vmul.f32 %v3242_v15, %v1508_v16  ;;  %v1703_v39 = vmul.f32 %v3267_v28, %v1508_v16  ;;  %v1803_v41 = vmul.f32 %v3270_v29, %v1508_v16 }
 0x17a   : > { %1587 = vrot.lane.b32.xlu1 %v3175_v49, %s2503_s4  ;;  %v1617_v53 = vadd.f32 %v1613_v2, %v1603_v33  ;;  %v1717_v16 = vadd.f32 %v1713_v5, %v1703_v39  ;;  %s2312_s4 = sld [smem:[#allocation2 + $0x6]] }
 0x17b   : > { %v1494_v35 = vpop.permute.xlu0 %1493 }
 0x17c   : > { %v1506_v23 = vsel %vm1505_vm9, 0.0, %v1494_v35 }
 0x17d   : > { %v1601_v36 = vmul.f32 %v3242_v15, %v1506_v23  ;;  %v1701_v20 = vmul.f32 %v3267_v28, %v1506_v23  ;;  %v1801_v37 = vmul.f32 %v3270_v29, %v1506_v23  ;;  %v1817_v23 = vadd.f32 %v1813_v6, %v1803_v41 }
 0x17e   : > { %v3204_v61 = vpop.permute.xlu2 %1552 }
 0x17f   : > { %v3190_v52 = vpop.permute.xlu1 %1495  ;;  %v1715_v58 = vadd.f32 %v1711_v63, %v1701_v20  ;;  %v1815_v59 = vadd.f32 %v1811_v1, %v1801_v37 }
 0x180   : > { %v1507_v51 = vsel %vm1505_vm9, 0.0, %v3190_v52 }
 0x183   : > { %v1500_v55 = vpop.permute.xlu0 %1499 }
 0x184   : > { %v1509_v11 = vsel %vm1505_vm9, 0.0, %v1500_v55 }
 0x185   : > { %v1704_v33 = vmul.f32 %v3267_v28, %v1509_v11 }
 0x186   : > { %v1515_v19 = vpop.permute.xlu2 %1514 }
 0x187   : > { %v1551_v57 = vpop.permute.xlu1 %1550 }
 0x188   : > { %v1563_v34 = vsel %vm1562_vm10, %v1551_v57, 0.0  ;;  %v1615_v57 = vadd.f32 %v1611_v62, %v1601_v36  ;;  %v1804_v36 = vmul.f32 %v3270_v29, %v1509_v11 }
 0x189   : > { %v1621_v56 = vmul.f32 %v3273_v30, %v1563_v34  ;;  %v1721_v46 = vmul.f32 %v3277_v40, %v1563_v34  ;;  %v1821_v48 = vmul.f32 %v3280_v9, %v1563_v34  ;;  %v1604_v34 = vmul.f32 %v3242_v15, %v1509_v11 }
 0x18b   : > { %v1555_v24 = vpop.permute.xlu0 %1554  ;;  %v1625_v55 = vadd.f32 %v1621_v56, %v1615_v57  ;;  %v1725_v49 = vadd.f32 %v1721_v46, %v1715_v58  ;;  %v1825_v47 = vadd.f32 %v1821_v48, %v1815_v59  ;;  %v1618_v11 = vadd.f32 %v3231_v10, %v1604_v34 }
 0x18c   : > { %v1565_v0 = vsel %vm1562_vm10, %v1555_v24, 0.0  ;;  %v1526_v24 = vsel %vm1505_vm9, 0.0, %v1515_v19 }
 0x18d   : > { %v1623_v22 = vmul.f32 %v3273_v30, %v1565_v0  ;;  %v1723_v50 = vmul.f32 %v3277_v40, %v1565_v0  ;;  %v1823_v35 = vmul.f32 %v3280_v9, %v1565_v0  ;;  %v1631_v52 = vmul.f32 %v3290_v42, %v1526_v24 }
 0x18e   : > { %v1731_v6 = vmul.f32 %v3293_v43, %v1526_v24  ;;  %v1831_v20 = vmul.f32 %v3296_v31, %v1526_v24  ;;  %v1521_v46 = vpop.permute.xlu2 %1520 }
 0x18f   : > { %v1557_v17 = vpop.permute.xlu1 %1556  ;;  %v1627_v4 = vadd.f32 %v1623_v22, %v1617_v53  ;;  %v1727_v54 = vadd.f32 %v1723_v50, %v1717_v16  ;;  %v1827_v0 = vadd.f32 %v1823_v35, %v1817_v23  ;;  %v1635_v41 = vadd.f32 %v1631_v52, %v1625_v55  ;;  %v3747_v55 = vld [vmem:[#allocation8_spill] sm:$0xff] }
 0x190   : > { %v1566_v63 = vsel %vm1562_vm10, %v1557_v17, 0.0  ;;  %v1602_v17 = vmul.f32 %v3242_v15, %v1507_v51  ;;  %v1735_v48 = vadd.f32 %v1731_v6, %v1725_v49  ;;  %v1835_v22 = vadd.f32 %v1831_v20, %v1825_v47 }
 0x191   : > { %v1624_v19 = vmul.f32 %v3273_v30, %v1566_v63  ;;  %v1724_v56 = vmul.f32 %v3277_v40, %v1566_v63  ;;  %v1824_v50 = vmul.f32 %v3280_v9, %v1566_v63  ;;  %v1564_v53 = vsel %vm1562_vm10, %v3204_v61, 0.0 }
 0x192   : > { %v1702_v47 = vmul.f32 %v3267_v28, %v1507_v51  ;;  %v1818_v49 = vadd.f32 %v3238_v13, %v1804_v36  ;;  %v1529_v10 = vsel %vm1505_vm9, 0.0, %v1521_v46  ;;  %v3346_v59 = vadd.f32 %v3251_v21, %v1735_v48 }
 0x193   : > { %v1628_v57 = vadd.f32 %v1624_v19, %v1618_v11  ;;  %v1616_v13 = vadd.f32 %v3225_v7, %v1602_v17  ;;  %v1634_v28 = vmul.f32 %v3290_v42, %v1529_v10  ;;  %v1722_v21 = vmul.f32 %v3277_v40, %v1564_v53 }
 0x194   : > { %v1828_v58 = vadd.f32 %v1824_v50, %v1818_v49  ;;  %v1716_v16 = vadd.f32 %v3228_v8, %v1702_v47  ;;  %v1642_v8 = vmul.f32 %v3215_v3, %v3147_v44  ;;  %v3392_v46 = vstv %s3358_s29  ;;  %s3442_s29 = sld [smem:[#allocation2 + $0x21]] }
 0x195   : > { %v1638_v7 = vadd.f32 %v1634_v28, %v1628_v57  ;;  %v3395_v48 = vstv %s3361_s30  ;;  %v3407_v47 = vstv %s2332_s6  ;;  %s3444_s30 = sld [smem:[#allocation2 + $0x22]] }
 0x196   : > { %v3372_v40 = vpop.permute.xlu2 %1571  ;;  %s3526_s6 = sld [smem:[#allocation2 + $0x25]] }
 0x197   : > { %v1519_v45 = vpop.permute.xlu1 %1518 }
 0x198   : > { %v1528_v62 = vsel %vm1505_vm9, 0.0, %v1519_v45 }
 0x199   : > { %v1633_v1 = vmul.f32 %v3290_v42, %v1528_v62  ;;  %v1733_v2 = vmul.f32 %v3293_v43, %v1528_v62  ;;  %v1833_v5 = vmul.f32 %v3296_v31, %v1528_v62 }
 0x19b   : > { %v1637_v37 = vadd.f32 %v1633_v1, %v1627_v4  ;;  %v1737_v45 = vadd.f32 %v1733_v2, %v1727_v54  ;;  %v1837_v39 = vadd.f32 %v1833_v5, %v1827_v0  ;;  %v1718_v54 = vadd.f32 %v3234_v12, %v1704_v33  ;;  %v3748_v0 = vld [vmem:[#allocation13_spill] sm:$0xff] }
 0x19c   : > { %v1802_v12 = vmul.f32 %v3270_v29, %v1507_v51  ;;  %v1734_v51 = vmul.f32 %v3293_v43, %v1529_v10  ;;  %v1834_v29 = vmul.f32 %v3296_v31, %v1529_v10  ;;  %v1744_v62 = vmul.f32 %v3748_v0, %v3747_v55 }
 0x19d   : > { %v3324_v35 = vadd.f32 %v3256_v25, %v1637_v37  ;;  %v3329_v4 = vadd.f32 %v3260_v26, %v1737_v45  ;;  %v3332_v15 = vadd.f32 %v3264_v27, %v1837_v39  ;;  %v1841_v25 = vmul.f32 %v3240_v14, %v3135_v38 }
 0x19e   : > { %v1728_v26 = vadd.f32 %v1724_v56, %v1718_v54  ;;  %v3343_v27 = vadd.f32 %v3247_v18, %v1635_v41  ;;  %v1812_v38 = vmul.f32 %v3196_v60, %v3099_v32  ;;  %v1622_v18 = vmul.f32 %v3273_v30, %v1564_v53 }
 0x19f   : > { %v3348_v61 = vadd.f32 %v1841_v25, %v1835_v22  ;;  %v1838_v32 = vadd.f32 %v1834_v29, %v1828_v58  ;;  %v1822_v60 = vmul.f32 %v3280_v9, %v1564_v53  ;;  %v1644_v30 = vmul.f32 %v3215_v3, %v3747_v55 }
 0x1a0   : > { %v1816_v23 = vadd.f32 %v1812_v38, %v1802_v12  ;;  %v1738_v24 = vadd.f32 %v1734_v51, %v1728_v26  ;;  %v1626_v63 = vadd.f32 %v1622_v18, %v1616_v13  ;;  %v1726_v1 = vadd.f32 %v1722_v21, %v1716_v16  ;;  %v3749_v18 = vld [vmem:[#allocation9_spill] sm:$0xff] }
 0x1a1   : > { %v1844_v9 = vmul.f32 %v3240_v14, %v3747_v55  ;;  %v1742_v33 = vmul.f32 %v3748_v0, %v3147_v44  ;;  %v3382_v36 = vadd.f32 %v1644_v30, %v1638_v7  ;;  %v3398_v22 = vstv %s3364_s3  ;;  %s3446_s3 = sld [smem:[#allocation2 + $0x23]] }
 0x1a2   : > { %v1826_v5 = vadd.f32 %v1822_v60, %v1816_v23  ;;  %v3384_v20 = vadd.f32 %v1744_v62, %v1738_v24  ;;  %v3405_v53 = vstv %s2322_s5  ;;  %v1670_v51 = vstv %s2313_s7  ;;  %s3459_s5 = sld [smem:[#allocation2 + $0x24]] }
 0x1a3   : > { %v3386_v37 = vadd.f32 %v1844_v9, %v1838_v32  ;;  %v1770_v29 = vstv %s2323_s8  ;;  %v1870_v16 = vstv %s2333_s14  ;;  %v1672_v23 = vmul.f32 %v1670_v51, %v3749_v18  ;;  %s3537_s7 = sld [smem:[#allocation2 + $0x26]]  ;;  %s151_s14 = sand.u32 1, %s2490_s10  }
 0x1a4   : > { %v1772_v21 = vmul.f32 %v1770_v29, %v3749_v18  ;;  %v1872_v7 = vmul.f32 %v1870_v16, %v3749_v18  ;;  %v1581_v0 = vsel %vm1562_vm10, %v3372_v40, 0.0  ;;  %s3542_s8 = sld [smem:[#allocation2 + $0x29]] }
 0x1a9   : > { %v1517_v34 = vpop.permute.xlu0 %1516 }
 0x1aa   : > { %v1527_v2 = vsel %vm1505_vm9, 0.0, %v1517_v34 }
 0x1ab   : > { %v1632_v52 = vmul.f32 %v3290_v42, %v1527_v2  ;;  %v1732_v6 = vmul.f32 %v3293_v43, %v1527_v2  ;;  %v1832_v3 = vmul.f32 %v3296_v31, %v1527_v2  ;;  %v1842_v43 = vmul.f32 %v3240_v14, %v3147_v44  ;;  %v1570_v31 = vpop.permute.xlu1 %1569  ;;  %v1537_v44 = vpop.permute.xlu2 %1536  ;;  %v3751_v2 = vld [vmem:[#allocation11_spill] sm:$0xff] }
 0x1ac   : > { %v1580_v17 = vsel %vm1562_vm10, %v1570_v31, 0.0  ;;  %v3403_v14 = vstv %s2312_s4  ;;  %v1547_v49 = vsel %vm1505_vm9, 0.0, %v1537_v44  ;;  %s3454_s4 = sld [smem:[#allocation2 + $0x28]]  ;;  %v3457_v9 = vmul.f32 %v1670_v51, %v3751_v2 }
 0x1ad   : > { %v1636_v45 = vadd.f32 %v1632_v52, %v1626_v63  ;;  %v1736_v42 = vadd.f32 %v1732_v6, %v1726_v1  ;;  %v1836_v39 = vadd.f32 %v1832_v3, %v1826_v5  ;;  %v1652_v50 = vmul.f32 %v3392_v46, %v1580_v17  ;;  %v3752_v5 = vld [vmem:[#allocation12_spill] sm:$0xff] }
 0x1ae   : > { %v1752_v11 = vmul.f32 %v3395_v48, %v1580_v17  ;;  %v1852_v54 = vmul.f32 %v3398_v22, %v1580_v17  ;;  %v1662_v57 = vmul.f32 %v3403_v14, %v1547_v49  ;;  %v1762_v26 = vmul.f32 %v3405_v53, %v1547_v49 }
 0x1af   : > { %v1646_v41 = vadd.f32 %v1642_v8, %v1636_v45  ;;  %v1746_v19 = vadd.f32 %v1742_v33, %v1736_v42  ;;  %v1846_v56 = vadd.f32 %v1842_v43, %v1836_v39  ;;  %v1862_v58 = vmul.f32 %v3407_v47, %v1547_v49  ;;  %v3750_v8 = vld [vmem:[#allocation10_spill] sm:$0xff] }
 0x1b0   : > { %v1671_v55 = vmul.f32 %v1670_v51, %v3750_v8  ;;  %v1771_v30 = vmul.f32 %v1770_v29, %v3750_v8  ;;  %v1871_v1 = vmul.f32 %v1870_v16, %v3750_v8  ;;  %v3462_v52 = vmul.f32 %v1670_v51, %v3752_v5 }
 0x1b1   : > { %v1656_v25 = vadd.f32 %v1652_v50, %v1646_v41  ;;  %v1756_v10 = vadd.f32 %v1752_v11, %v1746_v19  ;;  %v1856_v12 = vadd.f32 %v1852_v54, %v1846_v56  ;;  %v1568_v34 = vpop.permute.xlu0 %1567  ;;  %v3465_v6 = vmul.f32 %v1770_v29, %v3752_v5 }
 0x1b2   : > { %v1579_v62 = vsel %vm1562_vm10, %v1568_v34, 0.0  ;;  %v3468_v40 = vmul.f32 %v1770_v29, %v3751_v2  ;;  %v3471_v3 = vmul.f32 %v1870_v16, %v3751_v2  ;;  %v3474_v33 = vstv %s3413_s16  ;;  %s2359_s16 = smul.u32 96, %s151_s14 }
 0x1b3   : > { %v1666_v13 = vadd.f32 %v1662_v57, %v1656_v25  ;;  %v1766_v38 = vadd.f32 %v1762_v26, %v1756_v10  ;;  %v1866_v28 = vadd.f32 %v1862_v58, %v1856_v12  ;;  %v3477_v45 = vstv %s3418_s17 }
 0x1b4   : > { %v3480_v42 = vstv %s3420_s21  ;;  %v3483_v39 = vmul.f32 %v1870_v16, %v3752_v5  ;;  %v1653_v43 = vmul.f32 %v3392_v46, %v1581_v0  ;;  %v1651_v31 = vmul.f32 %v3392_v46, %v1579_v62  ;;  %s3612_s17 = scalar_lea.vmem [#allocation5], %s2359_s16  ;;  %s2361_s21 = smul.u32 96, %s2542_s13 }
 0x1b5   : > { %v3422_v24 = vadd.f32 %v1672_v23, %v1666_v13  ;;  %v3424_v32 = vadd.f32 %v1772_v21, %v1766_v38  ;;  %v3426_v60 = vadd.f32 %v1872_v7, %v1866_v28  ;;  %v1751_v17 = vmul.f32 %v3395_v48, %v1579_v62 }
 0x1b6   : > { %v1851_v41 = vmul.f32 %v3398_v22, %v1579_v62  ;;  %v1753_v19 = vmul.f32 %v3395_v48, %v1581_v0  ;;  %v1853_v56 = vmul.f32 %v3398_v22, %v1581_v0  ;;  %v3492_v50 = vstv %s3428_s22 }
 0x1b7   : > { %v3495_v11 = vstv %s3430_s23  ;;  %v3498_v44 = vstv %s3432_s24  ;;  %v3501_v49 = vstv %s3434_s25  ;;  %v3504_v25 = vstv %s3436_s26  ;;  %s2045_s23 = scalar_lea.hbm %s3726_s2, %s2361_s21  ;;  %s2046_s24 = sshll.u32 %s3612_s17, 4  ;;  %s2047_s24 = int_to_ptr.vmem [resolvable:$true] %s2046_s24 }
 0x1b8   : > { %v1584_v54 = vpop.permute.xlu2 %1583  ;;  %v3507_v10 = vstv %s3438_s27  ;;  %v3510_v12 = vstv %s3440_s28  ;;  %v3513_v57 = vstv %s3442_s29  ;;  %v3516_v26 = vstv %s3444_s30  ;;  %s2048_s25 = sshll.u32 %s2045_s23, 4  ;;  %s2034_s26 = scalar_lea.sflag [#allocation3], %s151_s14  ;;  %s2049_s25 = int_to_ptr.hbm [resolvable:$true] %s2048_s25 }
 0x1b9   : > { %v1574_v63 = vpop.permute.xlu0 %1573  ;;  %v3519_v58 = vstv %s3446_s3  ;;  %v1655_v38 = vadd.f32 %v1651_v31, %v3343_v27  ;;  %v1755_v28 = vadd.f32 %v1751_v17, %v3346_v59  ;;  %v1855_v51 = vadd.f32 %v1851_v41, %v3348_v61  ;;  %s2446_s27 = sshra.s32 %s2049_s25, 4  ;;  %s2452_s3 = scalar_lea.hbm %s3726_s2, 192  ;;  %s2447_s27 = int_to_ptr.hbm [resolvable:$true] %s2446_s27 }
 0x1ba   : > { %v1595_v16 = vsel %vm1562_vm10, %v1584_v54, 0.0  ;;  %v3532_v7 = vstv %s3454_s4  ;;  %v3535_v34 = vstv %s3459_s5  ;;  %v1657_v27 = vadd.f32 %v1653_v43, %v3324_v35  ;;  %s2448_s28 = scalar_lea.hbm %s2447_s27, 96  ;;  %p2453_p3 = scmp.lt.s32.totalorder %s2447_s27, %s3726_s2 }
 0x1bb   : > { %v1757_v59 = vadd.f32 %v1753_v19, %v3329_v4  ;;  %v1582_v61 = vsel %vm1562_vm10, %v1574_v63, 0.0  ;;  %v1681_v5 = vmul.f32 %v3474_v33, %v1595_v16  ;;  %v1781_v31 = vmul.f32 %v3477_v45, %v1595_v16  ;;  %p2449_p0 = scmp.ne.s32.totalorder %s2447_s27, %s2448_s28  ;;  %p2454_p4 = scmp.lt.s32.totalorder %s2452_s3, %s2448_s28 }
 0x1bc   : > { %v1881_v17 = vmul.f32 %v3480_v42, %v1595_v16  ;;  %v1654_v63 = vmul.f32 %v3392_v46, %v1582_v61  ;;  %v1857_v19 = vadd.f32 %v1853_v56, %v3332_v15 }
 0x1bd   : > { %p2450_p1 = pnand %p2449_p0, %p2559_p5  ;;  %p2455_p7 = por %p2454_p4, %p2453_p3 }
 0x1bf   : > { %p2451_p2 = pneg %p2450_p1 }
 0x1c1   : > { %p2456_p8 = pnand %p2455_p7, %p2451_p2 }
 0x1d0   : > { %v1535_v13 = vpop.permute.xlu1 %1534 }
 0x1d1   : > { %v1546_v29 = vsel %vm1505_vm9, 0.0, %v1535_v13 }
 0x1d2   : > { %v1661_v18 = vmul.f32 %v3403_v14, %v1546_v29  ;;  %v1761_v23 = vmul.f32 %v3405_v53, %v1546_v29  ;;  %v1861_v21 = vmul.f32 %v3407_v47, %v1546_v29 }
 0x1d4   : > { %v1665_v8 = vadd.f32 %v1661_v18, %v1655_v38  ;;  %v1765_v0 = vadd.f32 %v1761_v23, %v1755_v28  ;;  %v1865_v62 = vadd.f32 %v1861_v21, %v1855_v51  ;;  %v1539_v2 = vpop.permute.xlu0 %1538  ;;  %v1590_v21 = vpop.permute.xlu2 %1589 }
 0x1d5   : > { %v1548_v41 = vsel %vm1505_vm9, 0.0, %v1539_v2 }
 0x1d6   : > { %v1675_v54 = vadd.f32 %v1671_v55, %v1665_v8  ;;  %v1775_v35 = vadd.f32 %v1771_v30, %v1765_v0  ;;  %v1875_v43 = vadd.f32 %v1871_v1, %v1865_v62  ;;  %v1663_v4 = vmul.f32 %v3403_v14, %v1548_v41 }
 0x1d7   : > { %v1763_v13 = vmul.f32 %v3405_v53, %v1548_v41  ;;  %v1863_v38 = vmul.f32 %v3407_v47, %v1548_v41  ;;  %v1754_v55 = vmul.f32 %v3395_v48, %v1582_v61  ;;  %v1854_v30 = vmul.f32 %v3398_v22, %v1582_v61 }
 0x1d8   : > { %v1685_v28 = vadd.f32 %v1681_v5, %v1675_v54  ;;  %v1785_v51 = vadd.f32 %v1781_v31, %v1775_v35  ;;  %v1885_v29 = vadd.f32 %v1881_v17, %v1875_v43  ;;  %v1667_v16 = vadd.f32 %v1663_v4, %v1657_v27 }
 0x1d9   : > { %v1767_v1 = vadd.f32 %v1763_v13, %v1757_v59  ;;  %v1867_v18 = vadd.f32 %v1863_v38, %v1857_v19  ;;  %v3562_v8 = vstv %s3526_s6  ;;  %v3565_v27 = vstv %s3537_s7 }
 0x1da   : > { %v1691_v46 = vadd.f32 %v3492_v50, %v1685_v28  ;;  %v1791_v15 = vadd.f32 %v3495_v11, %v1785_v51  ;;  %v1891_v56 = vadd.f32 %v3498_v44, %v1885_v29  ;;  %v3559_v23 = vadd.f32 %v3457_v9, %v1667_v16 }
 0x1db   : > { %v3568_v48 = vadd.f32 %v3468_v40, %v1767_v1  ;;  %v3571_v22 = vadd.f32 %v3471_v3, %v1867_v18  ;;  %v3574_v59 = vstv %s3542_s8  ;;  %v1658_v9 = vadd.f32 %v1654_v63, %v3382_v36 }
 0x1dc   : > { %v1695_v61 = vmax.f32 %v1691_v46, 0.0  ;;  %v1795_v0 = vmax.f32 %v1791_v15, 0.0  ;;  %v1895_v62 = vmax.f32 %v1891_v56, 0.0  ;;  %v1586_v2 = vpop.permute.xlu0 %1585  ;;  %v1758_v5 = vadd.f32 %v1754_v55, %v3384_v20 }
 0x1dd   : > { %v1858_v31 = vadd.f32 %v1854_v30, %v3386_v37  ;;  %v1596_v17 = vsel %vm1562_vm10, %v1586_v2, 0.0  ;;  %v1598_v40 = vsel %vm1562_vm10, %v1590_v21, 0.0 }
 0x1de   : > { %v1901_v3 = vmul.f32 %v3501_v49, %v1695_v61  ;;  %v1911_v41 = vmul.f32 %v3504_v25, %v1795_v0  ;;  %v1945_v54 = vmul.f32 %v3513_v57, %v1695_v61  ;;  %v1921_v35 = vmul.f32 %v3507_v10, %v1895_v62 }
 0x1df   : > { %v1955_v36 = vmul.f32 %v3516_v26, %v1795_v0  ;;  %v1990_v20 = vmul.f32 %v3535_v34, %v1695_v61  ;;  %v2000_v43 = vmul.f32 %v3562_v8, %v1795_v0  ;;  %v1965_v4 = vmul.f32 %v3519_v58, %v1895_v62 }
 0x1e0   : > { %v1915_v37 = vadd.f32 %v1911_v41, %v1901_v3  ;;  %v1682_v63 = vmul.f32 %v3474_v33, %v1596_v17  ;;  %v1782_v19 = vmul.f32 %v3477_v45, %v1596_v17  ;;  %v2010_v28 = vmul.f32 %v3565_v27, %v1895_v62 }
 0x1e1   : > { %v1959_v13 = vadd.f32 %v1955_v36, %v1945_v54  ;;  %v2004_v38 = vadd.f32 %v2000_v43, %v1990_v20  ;;  %v1882_v51 = vmul.f32 %v3480_v42, %v1596_v17  ;;  %v1684_v29 = vmul.f32 %v3474_v33, %v1598_v40 }
 0x1e2   : > { %v1925_v16 = vadd.f32 %v1921_v35, %v1915_v37  ;;  %v1686_v55 = vadd.f32 %v1682_v63, %v3422_v24  ;;  %v1786_v30 = vadd.f32 %v1782_v19, %v3424_v32  ;;  %v1784_v1 = vmul.f32 %v3477_v45, %v1598_v40 }
 0x1e3   : > { %v1969_v18 = vadd.f32 %v1965_v4, %v1959_v13  ;;  %v2014_v46 = vadd.f32 %v2010_v28, %v2004_v38  ;;  %v1886_v15 = vadd.f32 %v1882_v51, %v3426_v60  ;;  %v1884_v56 = vmul.f32 %v3480_v42, %v1598_v40 }
 0x1e4   : > { %v1931_v21 = vadd.f32 %v3510_v12, %v1925_v16  ;;  %v1541_v61 = vpop.permute.xlu1 %1540  ;;  %v1692_v0 = vadd.f32 %v3492_v50, %v1686_v55  ;;  %v1792_v62 = vadd.f32 %v3495_v11, %v1786_v30 }
 0x1e5   : > { %v1975_v2 = vadd.f32 %v3532_v7, %v1969_v18  ;;  %v2020_v24 = vadd.f32 %v3574_v59, %v2014_v46  ;;  %v1549_v32 = vsel %vm1505_vm9, 0.0, %v1541_v61  ;;  %v1892_v17 = vadd.f32 %v3498_v44, %v1886_v15 }
 0x1e6   : > { %v1935_v3 = vmax.f32 %v1931_v21, 0.0  ;;  %v1664_v60 = vmul.f32 %v3403_v14, %v1549_v32  ;;  %v1764_v40 = vmul.f32 %v3405_v53, %v1549_v32  ;;  %v1864_v41 = vmul.f32 %v3407_v47, %v1549_v32 }
 0x1e7   : > { %v1979_v54 = vmax.f32 %v1975_v2, 0.0  ;;  %v2024_v35 = vmax.f32 %v2020_v24, 0.0  ;;  %v1696_v36 = vmax.f32 %v1692_v0, 0.0  ;;  %v1796_v20 = vmax.f32 %v1792_v62, 0.0 }
 0x1e8   : > { %1939 = vst.msk [vmem:[%s3612_s17] sm:$0xff] %vm177_vm0, %v1935_v3  ;;  %v1668_v43 = vadd.f32 %v1664_v60, %v1658_v9  ;;  %v1768_v37 = vadd.f32 %v1764_v40, %v1758_v5  ;;  %v1868_v4 = vadd.f32 %v1864_v41, %v1858_v31  ;;  %v1896_v63 = vmax.f32 %v1892_v17, 0.0 }
 0x1e9   : > { %2344 = vst.msk [vmem:[%s3612_s17 + $0x20] sm:$0xff] %vm177_vm0, %v1979_v54  ;;  %v1902_v14 = vmul.f32 %v3501_v49, %v1696_v36  ;;  %v1912_v53 = vmul.f32 %v3504_v25, %v1796_v20  ;;  %v1946_v47 = vmul.f32 %v3513_v57, %v1696_v36  ;;  %v1956_v19 = vmul.f32 %v3516_v26, %v1796_v20 }
 0x1ea   : > { %2352 = vst.msk [vmem:[%s3612_s17 + $0x40] sm:$0xff] %vm177_vm0, %v2024_v35  ;;  %v1678_v13 = vadd.f32 %v3462_v52, %v1668_v43  ;;  %v1778_v38 = vadd.f32 %v3465_v6, %v1768_v37  ;;  %v1878_v9 = vadd.f32 %v3483_v39, %v1868_v4  ;;  %v1922_v5 = vmul.f32 %v3507_v10, %v1896_v63 }
 0x1eb   : > { %v1916_v31 = vadd.f32 %v1912_v53, %v1902_v14  ;;  %v1960_v28 = vadd.f32 %v1956_v19, %v1946_v47  ;;  %v1966_v51 = vmul.f32 %v3519_v58, %v1896_v63  ;;  %v1991_v16 = vmul.f32 %v3535_v34, %v1696_v36 }
 0x1ec   : > { %v1688_v55 = vadd.f32 %v1684_v29, %v1678_v13  ;;  %v1788_v30 = vadd.f32 %v1784_v1, %v1778_v38  ;;  %v1888_v18 = vadd.f32 %v1884_v56, %v1878_v9  ;;  %v2001_v46 = vmul.f32 %v3562_v8, %v1796_v20  ;;  %v1588_v15 = vpop.permute.xlu1 %1587 }
 0x1ed   : > { %v1926_v21 = vadd.f32 %v1922_v5, %v1916_v31  ;;  %v1970_v52 = vadd.f32 %v1966_v51, %v1960_v28  ;;  %v2011_v6 = vmul.f32 %v3565_v27, %v1896_v63  ;;  %v1597_v39 = vsel %vm1562_vm10, %v1588_v15, 0.0 }
 0x1ee   : > { %v1694_v61 = vadd.f32 %v3492_v50, %v1688_v55  ;;  %v1794_v0 = vadd.f32 %v3495_v11, %v1788_v30  ;;  %v1894_v62 = vadd.f32 %v3498_v44, %v1888_v18  ;;  %v2005_v2 = vadd.f32 %v2001_v46, %v1991_v16 }
 0x1ef   : > { %v1932_v29 = vadd.f32 %v3510_v12, %v1926_v21  ;;  %v1976_v1 = vadd.f32 %v3532_v7, %v1970_v52  ;;  %v1683_v56 = vmul.f32 %v3474_v33, %v1597_v39  ;;  %v1783_v24 = vmul.f32 %v3477_v45, %v1597_v39 }
 0x1f0   : > { %v1698_v32 = vmax.f32 %v1694_v61, 0.0  ;;  %v1798_v17 = vmax.f32 %v1794_v0, 0.0  ;;  %v1898_v3 = vmax.f32 %v1894_v62, 0.0  ;;  %v2015_v60 = vadd.f32 %v2011_v6, %v2005_v2 }
 0x1f1   : > { %v1936_v40 = vmax.f32 %v1932_v29, 0.0  ;;  %v1980_v41 = vmax.f32 %v1976_v1, 0.0  ;;  %v1687_v54 = vadd.f32 %v1683_v56, %v3559_v23  ;;  %v1787_v35 = vadd.f32 %v1783_v24, %v3568_v48 }
 0x1f2   : > { %v1904_v36 = vmul.f32 %v3501_v49, %v1698_v32  ;;  %v1914_v20 = vmul.f32 %v3504_v25, %v1798_v17  ;;  %v1924_v33 = vmul.f32 %v3507_v10, %v1898_v3  ;;  %v1948_v45 = vmul.f32 %v3513_v57, %v1698_v32 }
 0x1f3   : > { %v1958_v43 = vmul.f32 %v3516_v26, %v1798_v17  ;;  %v1968_v37 = vmul.f32 %v3519_v58, %v1898_v3  ;;  %v1993_v4 = vmul.f32 %v3535_v34, %v1698_v32  ;;  %v2003_v63 = vmul.f32 %v3562_v8, %v1798_v17  ;;  %1940 = vst.msk [vmem:[%s3612_s17 + $0x8] sm:$0xff] %vm177_vm0, %v1936_v40 }
 0x1f4   : > { %v1918_v23 = vadd.f32 %v1914_v20, %v1904_v36  ;;  %v2013_v48 = vmul.f32 %v3565_v27, %v1898_v3  ;;  %2345 = vst.msk [vmem:[%s3612_s17 + $0x28] sm:$0xff] %vm177_vm0, %v1980_v41  ;;  %v2021_v14 = vadd.f32 %v3574_v59, %v2015_v60  ;;  %v1693_v53 = vadd.f32 %v3492_v50, %v1687_v54 }
 0x1f5   : > { %v1962_v47 = vadd.f32 %v1958_v43, %v1948_v45  ;;  %v2007_v19 = vadd.f32 %v2003_v63, %v1993_v4  ;;  %v1793_v13 = vadd.f32 %v3495_v11, %v1787_v35  ;;  %v1883_v38 = vmul.f32 %v3480_v42, %v1597_v39 }
 0x1f6   : > { %v1928_v9 = vadd.f32 %v1924_v33, %v1918_v23  ;;  %v2025_v5 = vmax.f32 %v2021_v14, 0.0  ;;  %v1697_v31 = vmax.f32 %v1693_v53, 0.0 }
 0x1f7   : > { %v1972_v28 = vadd.f32 %v1968_v37, %v1962_v47  ;;  %v2017_v51 = vadd.f32 %v2013_v48, %v2007_v19  ;;  %v1797_v16 = vmax.f32 %v1793_v13, 0.0  ;;  %v1887_v55 = vadd.f32 %v1883_v38, %v3571_v22 }
 0x1f8   : > { %v1934_v30 = vadd.f32 %v3510_v12, %v1928_v9  ;;  %2353 = vst.msk [vmem:[%s3612_s17 + $0x48] sm:$0xff] %vm177_vm0, %v2025_v5  ;;  %v1903_v50 = vmul.f32 %v3501_v49, %v1697_v31  ;;  %v1947_v11 = vmul.f32 %v3513_v57, %v1697_v31  ;;  %v1992_v42 = vmul.f32 %v3535_v34, %v1697_v31 }
 0x1f9   : > { %v1978_v18 = vadd.f32 %v3532_v7, %v1972_v28  ;;  %v2023_v46 = vadd.f32 %v3574_v59, %v2017_v51  ;;  %v1893_v15 = vadd.f32 %v3498_v44, %v1887_v55  ;;  %v1913_v22 = vmul.f32 %v3504_v25, %v1797_v16 }
 0x1fa   : > { %v1938_v21 = vmax.f32 %v1934_v30, 0.0  ;;  %v1957_v52 = vmul.f32 %v3516_v26, %v1797_v16  ;;  %v2002_v6 = vmul.f32 %v3562_v8, %v1797_v16 }
 0x1fb   : > { %v1982_v49 = vmax.f32 %v1978_v18, 0.0  ;;  %v2027_v57 = vmax.f32 %v2023_v46, 0.0  ;;  %v1897_v39 = vmax.f32 %v1893_v15, 0.0  ;;  %v1917_v34 = vadd.f32 %v1913_v22, %v1903_v50 }
 0x1fc   : > { %1942 = vst.msk [vmem:[%s3612_s17 + $0x18] sm:$0xff] %vm177_vm0, %v1938_v21  ;;  %v1961_v61 = vadd.f32 %v1957_v52, %v1947_v11  ;;  %v2006_v0 = vadd.f32 %v2002_v6, %v1992_v42 }
 0x1fd   : > { %2347 = vst.msk [vmem:[%s3612_s17 + $0x38] sm:$0xff] %vm177_vm0, %v1982_v49  ;;  %v1923_v44 = vmul.f32 %v3507_v10, %v1897_v39  ;;  %v1967_v25 = vmul.f32 %v3519_v58, %v1897_v39  ;;  %v2012_v26 = vmul.f32 %v3565_v27, %v1897_v39 }
 0x1fe   : > { %2355 = vst.msk [vmem:[%s3612_s17 + $0x58] sm:$0xff] %vm177_vm0, %v2027_v57 }
 0x1ff   : > { %v1927_v8 = vadd.f32 %v1923_v44, %v1917_v34  ;;  %v1971_v62 = vadd.f32 %v1967_v25, %v1961_v61  ;;  %v2016_v2 = vadd.f32 %v2012_v26, %v2006_v0 }
 0x201   : > { %v1933_v29 = vadd.f32 %v3510_v12, %v1927_v8  ;;  %v1977_v10 = vadd.f32 %v3532_v7, %v1971_v62  ;;  %v2022_v58 = vadd.f32 %v3574_v59, %v2016_v2 }
 0x203   : > { %v1937_v27 = vmax.f32 %v1933_v29, 0.0  ;;  %v1981_v1 = vmax.f32 %v1977_v10, 0.0  ;;  %v2026_v56 = vmax.f32 %v2022_v58, 0.0 }
 0x205   : > { %1941 = vst.msk [vmem:[%s3612_s17 + $0x10] sm:$0xff] %vm177_vm0, %v1937_v27 }
 0x206   : > { %2346 = vst.msk [vmem:[%s3612_s17 + $0x30] sm:$0xff] %vm177_vm0, %v1981_v1 }
 0x207   : > { %2354 = vst.msk [vmem:[%s3612_s17 + $0x50] sm:$0xff] %vm177_vm0, %v2026_v56 }
 0x208   : > { %2459 = shalt.err (!%p2456_p8)
}
 0x209   : > { %s2504_s6 = smov 128   ;;  %s2505_s7 = smov 8  }
 0x20a   : > { %2366 = dma.vmem_to_hbm [thread:$0]  (%p2559_p5), %s2047_s24, 1536, %s2049_s25, %s2034_s26, %s2504_s6, %s2504_s6, %s2505_s7  }
 0x20b PF: > { %p2378_p9 = scmp.ge.s32.totalorder %s2498_s12, 2  ;;  %s2063_s8 = sand.u32 1, %s2486_s9  }
 0x20c   : > { %s2064_s14 = scalar_lea.sflag [#allocation3], %s2063_s8 }
 0x20d   : > { %p2373_p10 = pnand %p2378_p9, %p2563_p6 }
 0x20f   : > { %p2374_p11 = pneg %p2373_p10 }
 0x211   : > { %2481 = dma.done.wait (%p2374_p11), %s2064_s14, 1536  }
 0x212   : > { %2483 = vsyncadd (%p2374_p11), %s2064_s14, 4294965760  ;;  %p13_p12 = scmp.ge.s32.totalorder %s2546_s15, 4   ;;  %s3753_s9 = smov %s2490_s10 }
 0x213   : > { %s3754_s10 = smov %s2494_s11  ;;  %s3755_s11 = smov %s2557_s18 }
 0x214   : > { %s3756_s12 = smov %s2546_s15  ;;  %15 = sbr.rel (!%p13_p12) target bundleno = 4 (0x4), region = 81 }
 0x219   :  { %2070 = vsyncpa [#allocation3], 1 }
 0x21a   :  { %2072 = vsyncpa [#allocation3 + $0x1], 1 }
 0x21b   :  { %2073 = vsyncpa [#allocation4], 1 }
 0x21c   :  { %2075 = vsyncpa [#allocation4 + $0x1], 1 }

</bundles_post_ra>
